<compile_context>
chip_gen: v7x
topology: tpu7x:2x2x1
jax: 0.10.0
libtpu: 0.0.40
codegen_flags: <defaults>
</compile_context>

<pallas_src>
import functools

import jax
import jax.numpy as jnp
from jax.experimental import pallas as pl
from jax.experimental.pallas import tpu as pltpu


# Conservative, generation-portable VMEM budgeting (v7x is the tightest chip:
# 64 MiB physical / 32 MiB scoped VMEM). The in-kernel interleave may
# materialise a relayout scratch copy of the tile, so the *input* block is kept
# small (<= _MAX_BLOCK_ELEMS elements) to bound that worst case, while the
# *output* block (sh*sw times larger) stays big enough to amortise the
# ~0.35 us per-grid-step overhead.
_MAX_BLOCK_ELEMS = 16 * 1024           # source-tile elements per grid step
_MAX_TW = 512                          # max lane tile of the source width
_VMEM_LIMIT_BYTES = 32 * 1024 * 1024   # explicit scoped-VMEM limit (v5e/v6e/v7x safe)
_MIN_GRID_STEPS = 4                    # let "parallel" axes shard across v7x's 2 TCs


def _upsample_block_kernel(x_ref, o_ref, *, sh: int, sw: int):
    """Nearest-neighbour upsample of one (th, tw) source tile.

    x_ref : (1, th, tw)         source tile (VMEM)
    o_ref : (1, th*sh, tw*sw)   output tile (VMEM), already in the final
                                (N*C, H_out, W_out) layout.

    Pure bandwidth body: one tile load, in-register lane/sublane interleave,
    one dense lane-aligned store. No MXU / EUP work.
    """
    x = x_ref[0]
    th, tw = x.shape
    y = x
    if sw > 1:
        # W interleave: y[:, c*sw + b] = x[:, c]   (lane expansion)
        y = jnp.broadcast_to(y[:, :, None], (th, tw, sw)).reshape(th, tw * sw)
    if sh > 1:
        # H interleave: y[r*sh + a, :] = row r     (sublane expansion)
        wo = tw * sw
        y = jnp.broadcast_to(y[:, None, :], (th, sh, wo)).reshape(th * sh, wo)
    o_ref[0] = y


def _pick_tiles(nc: int, h: int, w: int, sh: int, sw: int, itemsize: int):
    # Sublane pack of the dtype: 8 rows (f32), 16 (bf16/f16), 32 (int8/fp8).
    pack = max(8, 32 // max(1, itemsize))
    # Lane tile: full source width unless very wide; when tiled, keep it a
    # multiple of 128 so both the (.., tw) input block and the (.., tw*sw)
    # output block are lane-aligned (dense vst, no masked partial stores).
    tw = w if w <= _MAX_TW else (_MAX_TW // 128) * 128
    nw = pl.cdiv(w, tw)

    # Row tile from the element budget ...
    th = max(1, _MAX_BLOCK_ELEMS // tw)
    # ... capped so the grid has enough steps to shard across both v7x cores.
    steps_wo_h = nc * nw
    if steps_wo_h < _MIN_GRID_STEPS:
        th = min(th, pl.cdiv(h, pl.cdiv(_MIN_GRID_STEPS, steps_wo_h)))
    th = min(th, h)
    if th < h:
        # Partial-free sublane alignment; a full-height block needs no alignment.
        th = min(h, max(pack, (th // pack) * pack))
    return int(th), int(tw)


@functools.partial(jax.jit, static_argnames=("sh", "sw"))
def _upsample_nearest_nchw(x, *, sh: int, sw: int):
    n, c, h, w = x.shape
    nc = n * c
    # (N, C, H, W) -> (N*C, H, W): merges leading dims only, layout-free on TPU.
    x3 = x.reshape(nc, h, w)

    th, tw = _pick_tiles(nc, h, w, sh, sw, jnp.dtype(x.dtype).itemsize)
    grid = (nc, pl.cdiv(h, th), pl.cdiv(w, tw))

    in_bytes = x.size * jnp.dtype(x.dtype).itemsize
    out_bytes = in_bytes * sh * sw

    out3 = pl.pallas_call(
        functools.partial(_upsample_block_kernel, sh=sh, sw=sw),
        out_shape=jax.ShapeDtypeStruct((nc, h * sh, w * sw), x.dtype),
        grid=grid,
        in_specs=[pl.BlockSpec((1, th, tw), lambda b, i, j: (b, i, j))],
        out_specs=pl.BlockSpec((1, th * sh, tw * sw), lambda b, i, j: (b, i, j)),
        compiler_params=pltpu.CompilerParams(
            dimension_semantics=("parallel", "parallel", "parallel"),
            vmem_limit_bytes=_VMEM_LIMIT_BYTES,
        ),
        cost_estimate=pl.CostEstimate(
            flops=0, transcendentals=0, bytes_accessed=int(in_bytes + out_bytes)),
    )(x3)

    # (N*C, H*sh, W*sw) -> (N, C, H*sh, W*sw): splits the leading dim only, so
    # the minor (tiled) dims are untouched and no relayout copy is inserted.
    return out3.reshape(n, c, h * sh, w * sw)


class QUpsamplePallas:
    """Pallas port of sparsebit's QUpsample (nearest mode, NCHW)."""

    def __init__(self, scale_factor=2, mode="nearest"):
        if mode != "nearest":
            # TODO(synk): bilinear/bicubic need a gather + lerp kernel; not ported.
            raise NotImplementedError("only mode='nearest' is implemented")
        if isinstance(scale_factor, (tuple, list)):
            sh, sw = scale_factor
        else:
            sh = sw = scale_factor
        if float(sh) != int(sh) or float(sw) != int(sw):
            # TODO(synk): non-integer nearest scales need per-row source-index tables.
            raise NotImplementedError("only integer scale factors are implemented")
        self.sh, self.sw = int(sh), int(sw)
        self.mode = mode

    def __call__(self, x):
        # input_quantizer: identity here (sparsebit fake-fuses it for 'nearest').
        # TODO(synk): if a fake-quant scale/zero-point is configured, fuse it as a
        # single VPU multiply-add on the source tile inside the kernel.
        # TODO(synk): ideally fuse the whole upsample into the downstream consumer
        # so the expanded tensor is never written to HBM at all.
        return _upsample_nearest_nchw(x, sh=self.sh, sw=self.sw)


if __name__ == "__main__":
    key = jax.random.PRNGKey(0)
    x = jax.random.normal(key, (2, 4, 16, 16), dtype=jnp.float32)

    mod = QUpsamplePallas(scale_factor=2, mode="nearest")
    out = jax.block_until_ready(mod(x))

    # Pure-JAX reference for nearest upsampling (== F.interpolate(..., 'nearest')).
    ref = jnp.repeat(jnp.repeat(x, 2, axis=2), 2, axis=3)
    assert out.shape == (2, 4, 32, 32), out.shape
    assert bool(jnp.array_equal(out, ref)), "mismatch vs nearest-upsample reference"

    # Quick extra check: non-multiple-of-8 height and rectangular scale factors.
    x2 = jax.random.normal(jax.random.PRNGKey(1), (1, 3, 7, 9), dtype=jnp.float32)
    mod2 = QUpsamplePallas(scale_factor=(3, 2), mode="nearest")
    out2 = jax.block_until_ready(mod2(x2))
    ref2 = jnp.repeat(jnp.repeat(x2, 3, axis=2), 2, axis=3)
    assert bool(jnp.array_equal(out2, ref2)), "mismatch on odd-shape / (3,2) scale case"

    print("KERNEL_OK")
</pallas_src>

<mosaic_0001>
module attributes {stable_mosaic.version = 11 : i64} {
  func.func @_upsample_block_kernel(%arg0: i32, %arg1: i32, %arg2: i32, %arg3: memref<1x16x16xf32, #tpu.memory_space<vmem>>, %arg4: memref<1x32x32xf32, #tpu.memory_space<vmem>>) attributes {dimension_semantics = [#tpu.dimension_semantics<parallel>, #tpu.dimension_semantics<parallel>, #tpu.dimension_semantics<parallel>], iteration_bounds = array<i64: 8, 1, 1>, scalar_prefetch = 0 : i64, scratch_operands = 0 : i64, tpu.core_type = #tpu.core_type<tc>, window_params = [{transform_indices = @transform_0, window_bounds = array<i64: 1, 16, 16>}, {transform_indices = @transform_1, window_bounds = array<i64: 1, 32, 32>}]} {
    %c0 = arith.constant 0 : index
    %c0_0 = arith.constant 0 : index
    %c0_1 = arith.constant 0 : index
    %0 = vector.load %arg3[%c0, %c0_0, %c0_1] : memref<1x16x16xf32, #tpu.memory_space<vmem>>, vector<1x16x16xf32>
    %1 = vector.shape_cast %0 : vector<1x16x16xf32> to vector<16x16xf32>
    %2 = vector.shape_cast %1 : vector<16x16xf32> to vector<16x16x1xf32>
    %3 = vector.shape_cast %2 : vector<16x16x1xf32> to vector<16x16x1xf32>
    %4 = vector.broadcast %3 : vector<16x16x1xf32> to vector<16x16x2xf32>
    %5 = vector.shape_cast %4 : vector<16x16x2xf32> to vector<16x32xf32>
    %6 = vector.shape_cast %5 : vector<16x32xf32> to vector<16x1x32xf32>
    %7 = vector.shape_cast %6 : vector<16x1x32xf32> to vector<16x1x32xf32>
    %8 = vector.broadcast %7 : vector<16x1x32xf32> to vector<16x2x32xf32>
    %9 = vector.shape_cast %8 : vector<16x2x32xf32> to vector<32x32xf32>
    %c0_2 = arith.constant 0 : index
    %c0_3 = arith.constant 0 : index
    %c0_4 = arith.constant 0 : index
    %10 = vector.load %arg4[%c0_2, %c0_3, %c0_4] : memref<1x32x32xf32, #tpu.memory_space<vmem>>, vector<1x32x32xf32>
    %11 = vector.shape_cast %10 : vector<1x32x32xf32> to vector<32x32xf32>
    %12 = vector.shape_cast %9 : vector<32x32xf32> to vector<1x32x32xf32>
    tpu.vector_store %arg4[%c0_2, %c0_3, %c0_4], %12 {strides = array<i32>} : memref<1x32x32xf32, #tpu.memory_space<vmem>>, vector<1x32x32xf32>,
    return
  }
  func.func @transform_0(%arg0: i32, %arg1: i32, %arg2: i32) -> (i32, i32, i32) {
    %c0_i32 = arith.constant 0 : i32
    return %arg0, %arg1, %arg2 : i32, i32, i32
  }
  func.func @transform_1(%arg0: i32, %arg1: i32, %arg2: i32) -> (i32, i32, i32) {
    %c0_i32 = arith.constant 0 : i32
    return %arg0, %arg1, %arg2 : i32, i32, i32
  }
}

</mosaic_0001>

<bundles_post_ra>
// kernel: _upsample_nearest_nchw.1
= control target key start
LH: loop header
LB: loop body
LE: loop exit
PB: predicated region body
PF: predicated region fallthrough
CT: control target
= control target key end

     0   :  { %6 = vsyncpa [#allocation3], 0  ;;  %s5937_s0 = inlined_call_operand.hbm [shape: f32[8,16,16], index: 0, kind: input, shape index: {}]   ;;  %s5938_s1 = inlined_call_operand.hbm [shape: f32[8,32,32], index: 1, kind: output, shape index: {}]  }
   0x1   :  { %8 = vsyncpa [#allocation3 + $0x1], 0 }
   0x2   :  { %9 = vsyncpa [#allocation4], 0 }
   0x3   :  { %11 = vsyncpa [#allocation4 + $0x1], 0  ;;  %s3641_s6 = smov 0   ;;  %s3643_s7 = smov 0  }
   0x4   :  { %s3645_s8 = smov 0   ;;  %s3647_s9 = smov 0  }
   0x5   :  { %s3649_s10 = smov 0   ;;  %s3651_s11 = smov 0  }
   0x6 LB: > { %s3394_s12 = sadd.s32 4294967295, %s3606_s11   ;;  %s3395_s13 = sadd.s32 4294967294, %s3606_s11   ;;  %s3606_s11 = sphi %s3651_s11, %s17_s11   ;;  %s3602_s10 = sphi %s3649_s10, %s6277_s10   ;;  %s3598_s9 = sphi %s3647_s9, %s6276_s9   ;;  %s3594_s8 = sphi %s3645_s8, %s6275_s8   ;;  %s3590_s7 = sphi %s3643_s7, %s6274_s7   ;;  %s3586_s6 = sphi %s3641_s6, %s6273_s6  }
   0x7   : > { %s36_s14 = sadd.s32 1, %s3602_s10  ;;  %s47_s15 = sadd.s32 1, %s3594_s8 }
   0x8   : > { %p38_p0 = scmp.ge.s32.totalorder %s36_s14, 8  ;;  %p54_p1 = scmp.ne.s32.totalorder %s3594_s8, %s3590_s7 }
   0x9   : > { %p55_p2 = scmp.eq.s32.totalorder %s3606_s11, 0  ;;  %p60_p3 = scmp.ne.s32.totalorder %s3590_s7, %s3586_s6 }
   0xa   : > { %s6279_s14 = smov (%p38_p0, %s36_s14), 0  ;;  %p61_p5 = scmp.eq.s32.totalorder %s3394_s12, 0 }
   0xb   : > { %p3682_p4 = por %p55_p2, %p54_p1  ;;  %s40_s17 = ssub.s32 %s3602_s10, %s6279_s14 }
   0xc   : > { %p88_p6 = scmp.eq.s32.totalorder %s3394_s12, 7  ;;  %p45_p7 = scmp.eq.s32.totalorder %s40_s17, 0 }
   0xd   : > { %p3688_p8 = por %p61_p5, %p60_p3  ;;  %p94_p10 = scmp.eq.s32.totalorder %s3395_s13, 7 }
   0xe   : > { %p3692_p9 = por %p88_p6, %p54_p1  ;;  %p3423_p12 = scmp.lt.s32.totalorder %s3606_s11, 8 }
   0xf   : > { %s3697_s20 = scalar_select %p45_p7, %s3594_s8, %s47_s15  }
  0x10   : > { %s5965_s19 = scalar_select %p3692_p9, 1, 0 }
  0x11   : > { %p3699_p11 = por %p94_p10, %p60_p3  ;;  %s114_s22 = sand.u32 1, %s3594_s8  }
  0x12   : > { %s3398_s23 = sshll.u32 %s114_s22, 4  ;;  %s3409_s24 = sshll.u32 %s3602_s10, 8 }
  0x13   : > { %s5966_s21 = scalar_select %p3699_p11, 1, 0 }
  0x14   : > { %s3709_s27 = scalar_lea.hbm %s5937_s0, %s3409_s24  ;;  %s118_s28 = scalar_lea.vmem [#allocation2], %s3398_s23 }
  0x15   : > { %s128_s29 = sshll.u32 %s118_s28, 4  ;;  %p3715_p13 = pnand %p3423_p12, %p3682_p4  ;;  %s3711_s29 = int_to_ptr.vmem [resolvable:$true] %s128_s29 }
  0x16   : > { %s3720_s2 = scalar_lea.sflag [#allocation3], %s114_s22  ;;  %s3494_s3 = scalar_lea.hbm %s3709_s27, 256 }
  0x17   : > { %p3495_p1 = scmp.ne.s32.totalorder %s3709_s27, %s3494_s3  ;;  %p3496_p2 = pneg %p3715_p13 }
  0x18   : > { %s3499_s12 = scalar_lea.hbm %s5937_s0, 2048  ;;  %p3500_p4 = scmp.lt.u32.totalorder %s3709_s27, %s5937_s0 }
  0x19   : > { %p3497_p3 = pnand %p3496_p2, %p3495_p1  ;;  %p3501_p6 = scmp.lt.u32.totalorder %s3499_s12, %s3494_s3 }
  0x1a   : > { %p3503_p10 = scmp.lt.u32.totalorder %s3494_s3, %s3709_s27 }
  0x1b   : > { %p3498_p5 = pneg %p3497_p3  ;;  %p3502_p7 = por %p3501_p6, %p3500_p4 }
  0x1d   : > { %p3504_p12 = por %p3503_p10, %p3502_p7 }
  0x1f   : > { %p3505_p0 = pnand %p3504_p12, %p3498_p5 }
  0x21   : > { %3508 = shalt.err (!%p3505_p0)
}
  0x22   : > { %s3509_s16 = scalar_lea.vmem %s3711_s29, 256  ;;  %s3608_s17 = smov [#allocation2]  }
  0x23   : > { %p3510_p1 = scmp.ne.s32.totalorder %s3711_s29, %s3509_s16  ;;  %s3514_s22 = sshll.u32 %s3608_s17, 4  ;;  %s3515_s22 = int_to_ptr.vmem [resolvable:$false] %s3514_s22 }
  0x24   : > { %s3516_s23 = scalar_lea.vmem %s3515_s22, 512  ;;  %p3517_p9 = scmp.lt.s32.totalorder %s3711_s29, %s3515_s22 }
  0x25   : > { %p3512_p3 = pnand %p3510_p1, %p3496_p2  ;;  %p3518_p4 = scmp.lt.s32.totalorder %s3516_s23, %s3509_s16 }
  0x27   : > { %p3513_p11 = pneg %p3512_p3  ;;  %p3519_p6 = por %p3518_p4, %p3517_p9 }
  0x29   : > { %p3520_p7 = pnand %p3519_p6, %p3513_p11 }
  0x2b   : > { %3523 = shalt.err (!%p3520_p7)
}
  0x2c   : > { %s3609_s24 = smov 128   ;;  %s3610_s25 = smov 8  }
  0x2d   : > { %3418 = dma.hbm_to_vmem [thread:$0]  (!%p3715_p13), %s3709_s27, 256, %s3711_s29, %s3720_s2, %s3609_s24, %s3609_s24, %s3610_s25  }
  0x2e   : > { %p136_p0 = scmp.lt.s32.totalorder %s3606_s11, 9  ;;  %p5968_p2 = scmp.ge.s32.totalorder %s3606_s11, 1 }
  0x30   : > { %p137_p5 = pnand %p5968_p2, %p136_p0 }
  0x32   : > { %140 = sbr.rel (%p137_p5) target bundleno = 838 (0x346), region = 24 }
  0x39   : > { %s3752_s26 = sand.u32 1, %s3590_s7  }
  0x3a   : > { %s3402_s28 = sshll.u32 %s3752_s26, 4  ;;  %s143_s3 = scalar_lea.sflag [#allocation3], %s3752_s26 }
  0x3b   : > { %s3756_s4 = scalar_lea.vmem [#allocation2], %s3402_s28 }
  0x3c   : > { %3577 = dma.done.wait (%p3688_p8), %s143_s3, 256  }
  0x3d   : > { %3579 = vsyncadd (%p3688_p8), %s143_s3, 4294967040  ;;  %v169_v0 = vlaneseq  ;;  %v167_v4 = vld [vmem:[%s3756_s4] sm:$0xff]  ;;  %v168_v19 = vld [vmem:[%s3756_s4 + $0x8] sm:$0xff]  ;;  %v3611_v28 = vmov 1983009808   ;;  %v5948_v43 = vmov 0.0  }
  0x3e   : > { %v347_v29 = vunpack.c.l.s4 %v3611_v28  ;;  %v3612_v30 = vmov 1934713408   ;;  %s3614_s18 = smov 2   ;;  %s3615_s27 = smov 4   ;;  %vm2873_vm0 = vcmask 15360   ;;  %vm2890_vm1 = vcmask 31744  }
  0x3f   : > { %v3762_v1 = vshrl.u32 %v169_v0, 7  ;;  %v362_v31 = vunpack.c.l.s4 %v3612_v30  ;;  %s3616_s29 = smov 6   ;;  %s3617_s30 = smov 8   ;;  %vm2907_vm2 = vcmask 48128   ;;  %vm2924_vm3 = vcmask 64512  }
  0x40   : > { %v348_v32 = vunpack.c.0.s8 %v347_v29  ;;  %s3618_s2 = smov 10   ;;  %s3619_s5 = smov 12   ;;  %vm2941_vm4 = vcmask 80896   ;;  %vm2958_vm5 = vcmask 97280   ;;  %vm2975_vm6 = vcmask 113664  }
  0x41   : > { %v3765_v2 = vsub.s32 0, %v3762_v1  ;;  %v182_v3 = vsub.s32 1, %v3762_v1  ;;  %v193_v7 = vsub.s32 2, %v3762_v1  ;;  %v204_v9 = vsub.s32 3, %v3762_v1  ;;  %s3620_s12 = smov 14   ;;  %s3621_s13 = smov 16  }
  0x42   : > { %v215_v11 = vsub.s32 4, %v3762_v1  ;;  %v226_v13 = vsub.s32 5, %v3762_v1  ;;  %v237_v15 = vsub.s32 6, %v3762_v1  ;;  %v248_v17 = vsub.s32 7, %v3762_v1  ;;  %s3622_s15 = smov 18   ;;  %s3623_s16 = smov 20  }
  0x43   : > { %5969 = vst [vmem:[#allocation8_spill] sm:$0xff] %v3765_v2  ;;  %v183_v5 = vrot.slane %v167_v4, %v182_v3  ;;  %v172_v6 = vrot.slane %v167_v4, %v3765_v2  ;;  %v194_v8 = vrot.slane %v167_v4, %v193_v7  ;;  %v205_v10 = vrot.slane %v167_v4, %v204_v9  ;;  %s3624_s17 = smov 22   ;;  %s3625_s22 = smov 24  }
  0x44   : > { %v216_v12 = vrot.slane %v167_v4, %v215_v11  ;;  %v227_v14 = vrot.slane %v167_v4, %v226_v13  ;;  %v238_v16 = vrot.slane %v167_v4, %v237_v15  ;;  %v249_v18 = vrot.slane %v167_v4, %v248_v17  ;;  %s3626_s23 = smov 26   ;;  %s3627_s24 = smov 28  }
  0x45   : > { %185 = vbcast.lane.b32.xlu1 %v183_v5, 256  ;;  %174 = vbcast.lane.b32.xlu0 %v172_v6, 256  ;;  %v260_v20 = vrot.slane %v168_v19, %v3765_v2  ;;  %v271_v21 = vrot.slane %v168_v19, %v182_v3  ;;  %v282_v22 = vrot.slane %v168_v19, %v193_v7  ;;  %v363_v33 = vunpack.c.0.s8 %v362_v31  ;;  %s3628_s25 = smov 30   ;;  %s3403_s28 = sshll.u32 %s3752_s26, 5 }
  0x46   : > { %v293_v23 = vrot.slane %v168_v19, %v204_v9  ;;  %v304_v24 = vrot.slane %v168_v19, %v215_v11  ;;  %v315_v25 = vrot.slane %v168_v19, %v226_v13  ;;  %v326_v26 = vrot.slane %v168_v19, %v237_v15  ;;  %s5819_s3 = scalar_lea.vmem [#allocation5], %s3403_s28  ;;  %s3410_s4 = sshll.u32 %s3598_s9, 9 }
  0x47   : > { %v337_v27 = vrot.slane %v168_v19, %v248_v17  ;;  %v3779_v34 = vsub.s32 %v348_v32, %v3762_v1  ;;  %v3782_v35 = vsub.s32 %v363_v33, %v3762_v1  ;;  %vm2992_vm7 = vcmask 130048   ;;  %p6271_p9 = scmp.ne.s32.totalorder %s5965_s19, 0 }
  0x48   : > { %vm3009_vm8 = vcmask 146432   ;;  %vm3026_vm9 = vcmask 162816   ;;  %vm3043_vm10 = vcmask 179200   ;;  %vm3060_vm11 = vcmask 195584  }
  0x49   : > { %178 = vbcast.lane.b32.xlu0 %v172_v6, 264  ;;  %189 = vbcast.lane.b32.xlu1 %v183_v5, 264  ;;  %5970 = vst [vmem:[#allocation9_spill] sm:$0xff] %v3779_v34  ;;  %vm3077_vm12 = vcmask 211968   ;;  %vm3094_vm13 = vcmask 228352   ;;  %vm3111_vm14 = vcmask 244736  }
  0x4a   : > { %vm3280_vm15 = vcmask 261120  }
  0x4d   : > { %196 = vbcast.lane.b32.xlu0 %v194_v8, 256  ;;  %200 = vbcast.lane.b32.xlu1 %v194_v8, 264 }
  0x51   : > { %207 = vbcast.lane.b32.xlu0 %v205_v10, 256  ;;  %211 = vbcast.lane.b32.xlu1 %v205_v10, 264 }
  0x55   : > { %218 = vbcast.lane.b32.xlu0 %v216_v12, 256  ;;  %222 = vbcast.lane.b32.xlu1 %v216_v12, 264 }
  0x59   : > { %229 = vbcast.lane.b32.xlu0 %v227_v14, 256  ;;  %233 = vbcast.lane.b32.xlu1 %v227_v14, 264 }
  0x5d   : > { %240 = vbcast.lane.b32.xlu0 %v238_v16, 256  ;;  %244 = vbcast.lane.b32.xlu1 %v238_v16, 264 }
  0x61   : > { %251 = vbcast.lane.b32.xlu0 %v249_v18, 256  ;;  %255 = vbcast.lane.b32.xlu1 %v249_v18, 264 }
  0x65   : > { %262 = vbcast.lane.b32.xlu0 %v260_v20, 256  ;;  %266 = vbcast.lane.b32.xlu1 %v260_v20, 264 }
  0x69   : > { %273 = vbcast.lane.b32.xlu0 %v271_v21, 256  ;;  %277 = vbcast.lane.b32.xlu1 %v271_v21, 264 }
  0x6d   : > { %284 = vbcast.lane.b32.xlu0 %v282_v22, 256  ;;  %288 = vbcast.lane.b32.xlu1 %v282_v22, 264 }
  0x71   : > { %295 = vbcast.lane.b32.xlu0 %v293_v23, 256  ;;  %299 = vbcast.lane.b32.xlu1 %v293_v23, 264 }
  0x75   : > { %306 = vbcast.lane.b32.xlu0 %v304_v24, 256  ;;  %310 = vbcast.lane.b32.xlu1 %v304_v24, 264 }
  0x79   : > { %317 = vbcast.lane.b32.xlu0 %v315_v25, 256  ;;  %321 = vbcast.lane.b32.xlu1 %v315_v25, 264 }
  0x7d   : > { %328 = vbcast.lane.b32.xlu0 %v326_v26, 256  ;;  %332 = vbcast.lane.b32.xlu1 %v326_v26, 264 }
  0x81   : > { %339 = vbcast.lane.b32.xlu0 %v337_v27, 256  ;;  %343 = vbcast.lane.b32.xlu1 %v337_v27, 264 }
  0xb7   : > { %v3784_v36 = vpop.permute.xlu1 %185  ;;  %v3786_v37 = vpop.permute.xlu0 %174 }
  0xb8   : > { %v3790_v38 = vrot.slane %v3784_v36, %v3779_v34  ;;  %v3794_v39 = vrot.slane %v3786_v37, %v3779_v34 }
  0xba   : > { %v3798_v40 = vrot.slane %v3790_v38, %v3782_v35  ;;  %v3802_v41 = vrot.slane %v3794_v39, %v3782_v35 }
  0xbb   : > { %v3804_v42 = vpop.permute.xlu0 %178 }
  0xbc   : > { %v488_v44 = vcombine.high %v3798_v40, %v5948_v43  ;;  %v390_v45 = vcombine.high %v3802_v41, %v5948_v43 }
  0xbe   : > { %1931 = vrot.lane.b32.xlu1 %v488_v44, %s3614_s18  ;;  %1929 = vrot.lane.b32.xlu0 %v390_v45, %s3614_s18  ;;  %v360_v45 = vcombine.high %v3794_v39, %v5948_v43 }
  0xbf   : > { %v3812_v46 = vpop.permute.xlu0 %196 }
  0xc0   : > { %v3816_v47 = vrot.slane %v3812_v46, %v3779_v34  ;;  %v374_v39 = vrot.slane %v360_v45, %v3782_v35 }
  0xc2   : > { %v3820_v48 = vrot.slane %v3816_v47, %v3782_v35 }
  0xc3   : > { %v3822_v49 = vpop.permute.xlu0 %207 }
  0xc4   : > { %v3826_v50 = vrot.slane %v3822_v49, %v3779_v34  ;;  %v586_v51 = vcombine.high %v3820_v48, %v5948_v43 }
  0xc6   : > { %v3832_v52 = vrot.slane %v3826_v50, %v3782_v35  ;;  %1933 = vrot.lane.b32.xlu0 %v586_v51, %s3614_s18 }
  0xc7   : > { %v3835_v53 = vpop.permute.xlu0 %218 }
  0xc8   : > { %5971 = vst [vmem:[#allocation10_spill] sm:$0xff] %v3832_v52  ;;  %v3839_v54 = vrot.slane %v3835_v53, %v3779_v34  ;;  %v684_v55 = vcombine.high %v3832_v52, %v5948_v43 }
  0xca   : > { %v3845_v56 = vrot.slane %v3839_v54, %v3782_v35  ;;  %1935 = vrot.lane.b32.xlu1 %v684_v55, %s3614_s18 }
  0xcb   : > { %v3848_v57 = vpop.permute.xlu0 %229 }
  0xcc   : > { %5972 = vst [vmem:[#allocation11_spill] sm:$0xff] %v3845_v56  ;;  %v3852_v58 = vrot.slane %v3848_v57, %v3779_v34  ;;  %v782_v59 = vcombine.high %v3845_v56, %v5948_v43 }
  0xce   : > { %v3858_v60 = vrot.slane %v3852_v58, %v3782_v35  ;;  %1937 = vrot.lane.b32.xlu0 %v782_v59, %s3614_s18 }
  0xcf   : > { %v3861_v61 = vpop.permute.xlu0 %240 }
  0xd0   : > { %5973 = vst [vmem:[#allocation12_spill] sm:$0xff] %v3858_v60  ;;  %v3865_v62 = vrot.slane %v3861_v61, %v3779_v34  ;;  %v880_v63 = vcombine.high %v3858_v60, %v5948_v43 }
  0xd2   : > { %v3871_v0 = vrot.slane %v3865_v62, %v3782_v35  ;;  %1939 = vrot.lane.b32.xlu1 %v880_v63, %s3614_s18  ;;  %v3974_v63 = vpop.permute.xlu1 %189 }
  0xd3   : > { %v3874_v1 = vpop.permute.xlu0 %251 }
  0xd4   : > { %5974 = vst [vmem:[#allocation13_spill] sm:$0xff] %v3871_v0  ;;  %v3878_v3 = vrot.slane %v3874_v1, %v3779_v34  ;;  %v978_v4 = vcombine.high %v3871_v0, %v5948_v43 }
  0xd6   : > { %v3884_v5 = vrot.slane %v3878_v3, %v3782_v35  ;;  %1941 = vrot.lane.b32.xlu0 %v978_v4, %s3614_s18  ;;  %v458_v4 = vcombine.high %v3790_v38, %v5948_v43  ;;  %v3990_v38 = vpop.permute.xlu1 %200 }
  0xd7   : > { %v3887_v6 = vpop.permute.xlu0 %262 }
  0xd8   : > { %5975 = vst [vmem:[#allocation14_spill] sm:$0xff] %v3884_v5  ;;  %v3891_v7 = vrot.slane %v3887_v6, %v3779_v34  ;;  %v1076_v8 = vcombine.high %v3884_v5, %v5948_v43 }
  0xda   : > { %v3897_v9 = vrot.slane %v3891_v7, %v3782_v35  ;;  %1943 = vrot.lane.b32.xlu1 %v1076_v8, %s3614_s18  ;;  %v556_v8 = vcombine.high %v3816_v47, %v5948_v43  ;;  %v4002_v45 = vpop.permute.xlu1 %211 }
  0xdb   : > { %v3900_v10 = vpop.permute.xlu0 %273 }
  0xdc   : > { %5976 = vst [vmem:[#allocation15_spill] sm:$0xff] %v3897_v9  ;;  %v3904_v11 = vrot.slane %v3900_v10, %v3779_v34  ;;  %v1174_v12 = vcombine.high %v3897_v9, %v5948_v43  ;;  %v570_v47 = vrot.slane %v556_v8, %v3782_v35 }
  0xde   : > { %v3910_v13 = vrot.slane %v3904_v11, %v3782_v35  ;;  %1945 = vrot.lane.b32.xlu0 %v1174_v12, %s3614_s18  ;;  %v1242_v8 = vcombine.high %v3904_v11, %v5948_v43 }
  0xdf   : > { %v3913_v14 = vpop.permute.xlu0 %284 }
  0xe0   : > { %5977 = vst [vmem:[#allocation16_spill] sm:$0xff] %v3910_v13  ;;  %v1332_v15 = vrot.slane %v3913_v14, %v3779_v34  ;;  %v1272_v16 = vcombine.high %v3910_v13, %v5948_v43  ;;  %v1256_v11 = vrot.slane %v1242_v8, %v3782_v35 }
  0xe2   : > { %v3920_v17 = vrot.slane %v1332_v15, %v3782_v35  ;;  %1947 = vrot.lane.b32.xlu1 %v1272_v16, %s3614_s18  ;;  %v654_v16 = vcombine.high %v3826_v50, %v5948_v43 }
  0xe3   : > { %v3923_v18 = vpop.permute.xlu0 %295 }
  0xe4   : > { %5978 = vst [vmem:[#allocation17_spill] sm:$0xff] %v3920_v17  ;;  %v1430_v19 = vrot.slane %v3923_v18, %v3779_v34  ;;  %v1370_v20 = vcombine.high %v3920_v17, %v5948_v43 }
  0xe6   : > { %v3930_v21 = vrot.slane %v1430_v19, %v3782_v35  ;;  %1949 = vrot.lane.b32.xlu0 %v1370_v20, %s3614_s18  ;;  %v752_v20 = vcombine.high %v3839_v54, %v5948_v43  ;;  %v668_v54 = vrot.slane %v654_v16, %v3782_v35  ;;  %v4017_v16 = vpop.permute.xlu1 %222 }
  0xe7   : > { %v3933_v22 = vpop.permute.xlu0 %306 }
  0xe8   : > { %5979 = vst [vmem:[#allocation18_spill] sm:$0xff] %v3930_v21  ;;  %v1528_v23 = vrot.slane %v3933_v22, %v3779_v34  ;;  %v1468_v24 = vcombine.high %v3930_v21, %v5948_v43  ;;  %v766_v50 = vrot.slane %v752_v20, %v3782_v35 }
  0xea   : > { %v3940_v25 = vrot.slane %v1528_v23, %v3782_v35  ;;  %1951 = vrot.lane.b32.xlu1 %v1468_v24, %s3614_s18  ;;  %v472_v24 = vrot.slane %v458_v4, %v3782_v35  ;;  %v1144_v4 = vcombine.high %v3891_v7, %v5948_v43  ;;  %v1438_v7 = vcombine.high %v1430_v19, %v5948_v43  ;;  %v4027_v2 = vpop.permute.xlu1 %233 }
  0xeb   : > { %v3943_v26 = vpop.permute.xlu0 %317 }
  0xec   : > { %5980 = vst [vmem:[#allocation19_spill] sm:$0xff] %v3940_v25  ;;  %v1626_v27 = vrot.slane %v3943_v26, %v3779_v34  ;;  %v1566_v28 = vcombine.high %v3940_v25, %v5948_v43  ;;  %v1452_v19 = vrot.slane %v1438_v7, %v3782_v35 }
  0xee   : > { %v3950_v29 = vrot.slane %v1626_v27, %v3782_v35  ;;  %1953 = vrot.lane.b32.xlu0 %v1566_v28, %s3614_s18  ;;  %v850_v28 = vcombine.high %v3852_v58, %v5948_v43  ;;  %v4038_v8 = vpop.permute.xlu1 %244 }
  0xef   : > { %v3953_v30 = vpop.permute.xlu0 %328 }
  0xf0   : > { %5981 = vst [vmem:[#allocation20_spill] sm:$0xff] %v3950_v29  ;;  %v1724_v31 = vrot.slane %v3953_v30, %v3779_v34  ;;  %v1664_v32 = vcombine.high %v3950_v29, %v5948_v43 }
  0xf2   : > { %v3960_v33 = vrot.slane %v1724_v31, %v3782_v35  ;;  %1955 = vrot.lane.b32.xlu1 %v1664_v32, %s3614_s18  ;;  %v948_v32 = vcombine.high %v3865_v62, %v5948_v43  ;;  %v864_v62 = vrot.slane %v850_v28, %v3782_v35  ;;  %v1536_v28 = vcombine.high %v1528_v23, %v5948_v43  ;;  %v4046_v7 = vpop.permute.xlu1 %255 }
  0xf3   : > { %v3963_v44 = vpop.permute.xlu0 %339 }
  0xf4   : > { %5982 = vst [vmem:[#allocation21_spill] sm:$0xff] %v3960_v33  ;;  %v1822_v51 = vrot.slane %v3963_v44, %v3779_v34  ;;  %v1762_v55 = vcombine.high %v3960_v33, %v5948_v43  ;;  %v962_v58 = vrot.slane %v948_v32, %v3782_v35 }
  0xf6   : > { %v3972_v59 = vrot.slane %v1822_v51, %v3782_v35  ;;  %1957 = vrot.lane.b32.xlu0 %v1762_v55, %s3614_s18  ;;  %v1046_v55 = vcombine.high %v3878_v3, %v5948_v43  ;;  %v1158_v3 = vrot.slane %v1144_v4, %v3782_v35  ;;  %v1550_v4 = vrot.slane %v1536_v28, %v3782_v35 }
  0xf7   : > { %v1830_v23 = vcombine.high %v1822_v51, %v5948_v43  ;;  %v587_v51 = vcombine.high %v570_v47, %v5948_v43  ;;  %v489_v28 = vcombine.high %v472_v24, %v5948_v43 }
  0xf8   : > { %5983 = vst [vmem:[#allocation22_spill] sm:$0xff] %v3972_v59  ;;  %v1860_v12 = vcombine.high %v3972_v59, %v5948_v43  ;;  %v1060_v20 = vrot.slane %v1046_v55, %v3782_v35  ;;  %v1732_v55 = vcombine.high %v1724_v31, %v5948_v43 }
  0xf9   : > { %v1844_v31 = vrot.slane %v1830_v23, %v3782_v35  ;;  %v979_v23 = vcombine.high %v962_v58, %v5948_v43 }
  0xfa   : > { %1993 = vrot.lane.b32.xlu0 %v374_v39, %s3615_s27  ;;  %1959 = vrot.lane.b32.xlu1 %v1860_v12, %s3614_s18  ;;  %v1340_v12 = vcombine.high %v1332_v15, %v5948_v43  ;;  %v1634_v15 = vcombine.high %v1626_v27, %v5948_v43  ;;  %v391_v27 = vcombine.high %v374_v39, %v5948_v43  ;;  %s3302_s18 = sshll.u32 %s5819_s3, 4  ;;  %s5886_s18 = int_to_ptr.vmem [resolvable:$true] %s3302_s18 }
  0xfb   : > { %v783_v39 = vcombine.high %v766_v50, %v5948_v43  ;;  %s3524_s9 = scalar_lea.vmem %s5886_s18, 512 }
  0xfc   : > { %v1354_v32 = vrot.slane %v1340_v12, %v3782_v35  ;;  %v1746_v12 = vrot.slane %v1732_v55, %v3782_v35  ;;  %v1648_v59 = vrot.slane %v1634_v15, %v3782_v35  ;;  %v4054_v15 = vpop.permute.xlu1 %266  ;;  %v685_v55 = vcombine.high %v668_v54, %v5948_v43  ;;  %p3525_p8 = scmp.ne.s32.totalorder %s5886_s18, %s3524_s9 }
  0xfe   : > { %1997 = vrot.lane.b32.xlu0 %v570_v47, %s3615_s27  ;;  %1995 = vrot.lane.b32.xlu1 %v472_v24, %s3615_s27  ;;  %v881_v47 = vcombine.high %v864_v62, %v5948_v43  ;;  %v1175_v24 = vcombine.high %v1158_v3, %v5948_v43  ;;  %p3526_p11 = pnand %p3525_p8, %p6271_p9 }
 0x100   : > { %p3527_p13 = pneg %p3526_p11 }
 0x102   : > { %2001 = vrot.lane.b32.xlu0 %v766_v50, %s3615_s27  ;;  %1999 = vrot.lane.b32.xlu1 %v668_v54, %s3615_s27  ;;  %v1077_v50 = vcombine.high %v1060_v20, %v5948_v43 }
 0x106   : > { %2005 = vrot.lane.b32.xlu0 %v962_v58, %s3615_s27  ;;  %2003 = vrot.lane.b32.xlu1 %v864_v62, %s3615_s27  ;;  %v1371_v58 = vcombine.high %v1354_v32, %v5948_v43  ;;  %v1273_v62 = vcombine.high %v1256_v11, %v5948_v43 }
 0x10a   : > { %2009 = vrot.lane.b32.xlu0 %v1158_v3, %s3615_s27  ;;  %2007 = vrot.lane.b32.xlu1 %v1060_v20, %s3615_s27  ;;  %v1567_v3 = vcombine.high %v1550_v4, %v5948_v43  ;;  %v1469_v20 = vcombine.high %v1452_v19, %v5948_v43 }
 0x10e   : > { %2013 = vrot.lane.b32.xlu0 %v1354_v32, %s3615_s27  ;;  %2011 = vrot.lane.b32.xlu1 %v1256_v11, %s3615_s27  ;;  %v443_v32 = vcombine.high %v3784_v36, %v5948_v43  ;;  %v639_v36 = vcombine.high %v3822_v49, %v5948_v43 }
 0x110   : > { %v4116_v49 = vrot.slane %v639_v36, %v3779_v34 }
 0x112   : > { %2017 = vrot.lane.b32.xlu0 %v1550_v4, %s3615_s27  ;;  %2015 = vrot.lane.b32.xlu1 %v1452_v19, %s3615_s27  ;;  %v1665_v4 = vcombine.high %v1648_v59, %v5948_v43  ;;  %v4096_v19 = vrot.slane %v443_v32, %v3779_v34 }
 0x116   : > { %2021 = vrot.lane.b32.xlu0 %v1746_v12, %s3615_s27  ;;  %2019 = vrot.lane.b32.xlu1 %v1648_v59, %s3615_s27 }
 0x11a   : > { %2057 = vrot.lane.b32.xlu0 %v391_v27, %s3616_s29  ;;  %2023 = vrot.lane.b32.xlu1 %v1844_v31, %s3615_s27  ;;  %v4062_v27 = vpop.permute.xlu1 %277 }
 0x11e   : > { %2061 = vrot.lane.b32.xlu0 %v587_v51, %s3616_s29  ;;  %2059 = vrot.lane.b32.xlu1 %v489_v28, %s3616_s29  ;;  %v4070_v54 = vpop.permute.xlu1 %288  ;;  %v345_v51 = vcombine.high %v3786_v37, %v5948_v43  ;;  %v1763_v37 = vcombine.high %v1746_v12, %v5948_v43  ;;  %v1861_v12 = vcombine.high %v1844_v31, %v5948_v43 }
 0x120   : > { %v4087_v11 = vrot.slane %v345_v51, %v3779_v34  ;;  %v1129_v51 = vcombine.high %v3887_v6, %v5948_v43  ;;  %v1325_v6 = vcombine.high %v3913_v14, %v5948_v43 }
 0x122   : > { %2065 = vrot.lane.b32.xlu0 %v783_v39, %s3616_s29  ;;  %2063 = vrot.lane.b32.xlu1 %v685_v55, %s3616_s29  ;;  %v4080_v28 = vpop.permute.xlu1 %299  ;;  %v541_v39 = vcombine.high %v3812_v46, %v5948_v43  ;;  %v737_v46 = vcombine.high %v3835_v53, %v5948_v43  ;;  %v4109_v59 = vrot.slane %v4087_v11, %v3782_v35 }
 0x123   : > { %v835_v53 = vcombine.high %v3848_v57, %v5948_v43  ;;  %v4179_v14 = vrot.slane %v1325_v6, %v3779_v34 }
 0x124   : > { %v4101_v55 = vrot.slane %v541_v39, %v3779_v34  ;;  %v4161_v39 = vrot.slane %v1129_v51, %v3779_v34  ;;  %v1619_v51 = vcombine.high %v3943_v26, %v5948_v43 }
 0x125   : > { %v4140_v57 = vrot.slane %v835_v53, %v3779_v34  ;;  %v1362_v33 = vrot.slane %v4179_v14, %v3782_v35 }
 0x126   : > { %2069 = vrot.lane.b32.xlu0 %v979_v23, %s3616_s29  ;;  %2067 = vrot.lane.b32.xlu1 %v881_v47, %s3616_s29  ;;  %v4105_v23 = vpop.permute.xlu1 %310  ;;  %v4121_v47 = vrot.slane %v737_v46, %v3779_v34  ;;  %v4127_v31 = vrot.slane %v4101_v55, %v3782_v35  ;;  %v1423_v46 = vcombine.high %v3923_v18, %v5948_v43 }
 0x127   : > { %v872_v36 = vrot.slane %v4140_v57, %v3782_v35  ;;  %v1166_v53 = vrot.slane %v4161_v39, %v3782_v35  ;;  %v4210_v26 = vrot.slane %v1619_v51, %v3779_v34 }
 0x128   : > { %v4192_v18 = vrot.slane %v1423_v46, %v3779_v34 }
 0x129   : > { %v1656_v13 = vrot.slane %v4210_v26, %v3782_v35 }
 0x12a   : > { %2073 = vrot.lane.b32.xlu0 %v1175_v24, %s3616_s29  ;;  %2071 = vrot.lane.b32.xlu1 %v1077_v50, %s3616_s29  ;;  %v933_v24 = vcombine.high %v3861_v61, %v5948_v43  ;;  %v4131_v50 = vrot.slane %v4096_v19, %v3782_v35  ;;  %v1031_v61 = vcombine.high %v3874_v1, %v5948_v43 }
 0x12b   : > { %v1227_v1 = vcombine.high %v3900_v10, %v5948_v43  ;;  %v1460_v17 = vrot.slane %v4192_v18, %v3782_v35 }
 0x12c   : > { %v4156_v32 = vrot.slane %v1031_v61, %v3779_v34 }
 0x12d   : > { %v4174_v10 = vrot.slane %v1227_v1, %v3779_v34  ;;  %v1717_v1 = vcombine.high %v3953_v30, %v5948_v43  ;;  %v1815_v30 = vcombine.high %v3963_v44, %v5948_v43 }
 0x12e   : > { %2077 = vrot.lane.b32.xlu0 %v1371_v58, %s3616_s29  ;;  %2075 = vrot.lane.b32.xlu1 %v1273_v62, %s3616_s29  ;;  %v4133_v58 = vpop.permute.xlu1 %321  ;;  %v4145_v62 = vrot.slane %v933_v24, %v3779_v34  ;;  %v1068_v24 = vrot.slane %v4156_v32, %v3782_v35 }
 0x12f   : > { %v1264_v29 = vrot.slane %v4174_v10, %v3782_v35  ;;  %v4213_v46 = vrot.slane %v1717_v1, %v3779_v34  ;;  %v4228_v51 = vrot.slane %v1815_v30, %v3779_v34  ;;  %v5988_v30 = vmov 0.0  }
 0x130   : > { %v4201_v6 = vpop.permute.xlu0 %1929  ;;  %v392_v0 = vcombine.high %v4109_v59, %v5988_v30  ;;  %v588_v56 = vcombine.high %v4127_v31, %v5988_v30 }
 0x131   : > { %v1852_v60 = vrot.slane %v4228_v51, %v3782_v35 }
 0x132   : > { %2081 = vrot.lane.b32.xlu0 %v1567_v3, %s3616_s29  ;;  %2079 = vrot.lane.b32.xlu1 %v1469_v20, %s3616_s29  ;;  %v774_v3 = vrot.slane %v4121_v47, %v3782_v35  ;;  %v676_v20 = vrot.slane %v4116_v49, %v3782_v35 }
 0x136   : > { %2085 = vrot.lane.b32.xlu0 %v1763_v37, %s3616_s29  ;;  %2083 = vrot.lane.b32.xlu1 %v1665_v4, %s3616_s29  ;;  %v4165_v37 = vpop.permute.xlu1 %332  ;;  %v970_v4 = vrot.slane %v4145_v62, %v3782_v35 }
 0x138   : > { %v4219_v25 = vpop.permute.xlu0 %1933 }
 0x13a   : > { %2121 = vrot.lane.b32.xlu0 %v4109_v59, %s3617_s30  ;;  %2087 = vrot.lane.b32.xlu1 %v1861_v12, %s3616_s29  ;;  %v1521_v12 = vcombine.high %v3933_v22, %v5948_v43  ;;  %v4187_v61 = vpop.permute.xlu1 %343  ;;  %v1754_v43 = vrot.slane %v4213_v46, %v3782_v35  ;;  %v784_v59 = vcombine.high %v774_v3, %v5988_v30 }
 0x13c   : > { %v4197_v22 = vrot.slane %v1521_v12, %v3779_v34 }
 0x13e   : > { %2125 = vrot.lane.b32.xlu0 %v4127_v31, %s3617_s30  ;;  %2123 = vrot.lane.b32.xlu1 %v4131_v50, %s3617_s30  ;;  %v4217_v12 = vpop.permute.xlu1 %1931  ;;  %v1558_v21 = vrot.slane %v4197_v22, %v3782_v35  ;;  %v980_v31 = vcombine.high %v970_v4, %v5988_v30 }
 0x140   : > { %v4232_v44 = vpop.permute.xlu0 %1937 }
 0x141   : > { %5985 = vst [vmem:[#allocation24_spill] sm:$0xff] %v4232_v44 }
 0x142   : > { %2129 = vrot.lane.b32.xlu0 %v774_v3, %s3617_s30  ;;  %2127 = vrot.lane.b32.xlu1 %v676_v20, %s3617_s30  ;;  %v4230_v1 = vpop.permute.xlu1 %1935  ;;  %v1078_v3 = vcombine.high %v1068_v24, %v5988_v30 }
 0x143   : > { %5984 = vst [vmem:[#allocation23_spill] sm:$0xff] %v4230_v1 }
 0x146   : > { %2133 = vrot.lane.b32.xlu0 %v970_v4, %s3617_s30  ;;  %2131 = vrot.lane.b32.xlu1 %v872_v36, %s3617_s30  ;;  %v4240_v9 = vpop.permute.xlu1 %1939  ;;  %v1372_v4 = vcombine.high %v1362_v33, %v5988_v30 }
 0x147   : > { %5986 = vst [vmem:[#allocation25_spill] sm:$0xff] %v4240_v9 }
 0x148   : > { %v4242_v5 = vpop.permute.xlu0 %1941 }
 0x149   : > { %5987 = vst [vmem:[#allocation26_spill] sm:$0xff] %v4242_v5  ;;  %v490_v5 = vcombine.high %v4131_v50, %v5988_v30  ;;  %v882_v50 = vcombine.high %v872_v36, %v5988_v30  ;;  %v1274_v36 = vcombine.high %v1264_v29, %v5988_v30 }
 0x14a   : > { %2137 = vrot.lane.b32.xlu0 %v1166_v53, %s3617_s30  ;;  %2135 = vrot.lane.b32.xlu1 %v1068_v24, %s3617_s30  ;;  %v1470_v24 = vcombine.high %v1460_v17, %v5988_v30 }
 0x14c   : > { %v4252_v44 = vpop.permute.xlu1 %1943 }
 0x14e   : > { %2141 = vrot.lane.b32.xlu0 %v1362_v33, %s3617_s30  ;;  %2139 = vrot.lane.b32.xlu1 %v1264_v29, %s3617_s30  ;;  %v375_v29 = vcombine.high %v4087_v11, %v5988_v30  ;;  %v1764_v33 = vcombine.high %v1754_v43, %v5988_v30  ;;  %v1862_v11 = vcombine.high %v1852_v60, %v5988_v30 }
 0x150   : > { %v4254_v52 = vpop.permute.xlu0 %1945 }
 0x151   : > { %5989 = vst [vmem:[#allocation27_spill] sm:$0xff] %v4254_v52 }
 0x152   : > { %2145 = vrot.lane.b32.xlu0 %v1558_v21, %s3617_s30  ;;  %2143 = vrot.lane.b32.xlu1 %v1460_v17, %s3617_s30  ;;  %v473_v17 = vcombine.high %v4096_v19, %v5988_v30  ;;  %v767_v19 = vcombine.high %v4121_v47, %v5988_v30 }
 0x154   : > { %v4262_v9 = vpop.permute.xlu1 %1947 }
 0x155   : > { %5990 = vst [vmem:[#allocation28_spill] sm:$0xff] %v4262_v9 }
 0x156   : > { %2149 = vrot.lane.b32.xlu0 %v1754_v43, %s3617_s30  ;;  %2147 = vrot.lane.b32.xlu1 %v1656_v13, %s3617_s30 }
 0x158   : > { %v4264_v1 = vpop.permute.xlu0 %1949 }
 0x159   : > { %5991 = vst [vmem:[#allocation29_spill] sm:$0xff] %v4264_v1 }
 0x15a   : > { %2185 = vrot.lane.b32.xlu0 %v392_v0, %s3618_s2  ;;  %2151 = vrot.lane.b32.xlu1 %v1852_v60, %s3617_s30  ;;  %v686_v0 = vcombine.high %v676_v20, %v5988_v30 }
 0x15c   : > { %v4270_v52 = vpop.permute.xlu1 %1951 }
 0x15d   : > { %5992 = vst [vmem:[#allocation30_spill] sm:$0xff] %v4270_v52 }
 0x15e   : > { %2189 = vrot.lane.b32.xlu0 %v588_v56, %s3618_s2  ;;  %2187 = vrot.lane.b32.xlu1 %v490_v5, %s3618_s2  ;;  %v1176_v5 = vcombine.high %v1166_v53, %v5988_v30  ;;  %v1568_v53 = vcombine.high %v1558_v21, %v5988_v30 }
 0x160   : > { %v4272_v56 = vpop.permute.xlu0 %1953 }
 0x161   : > { %5993 = vst [vmem:[#allocation31_spill] sm:$0xff] %v4272_v56 }
 0x162   : > { %2193 = vrot.lane.b32.xlu0 %v784_v59, %s3618_s2  ;;  %2191 = vrot.lane.b32.xlu1 %v686_v0, %s3618_s2 }
 0x164   : > { %v4278_v20 = vpop.permute.xlu1 %1955 }
 0x165   : > { %5994 = vst [vmem:[#allocation32_spill] sm:$0xff] %v4278_v20 }
 0x166   : > { %2197 = vrot.lane.b32.xlu0 %v980_v31, %s3618_s2  ;;  %2195 = vrot.lane.b32.xlu1 %v882_v50, %s3618_s2 }
 0x168   : > { %v4280_v59 = vpop.permute.xlu0 %1957 }
 0x169   : > { %5995 = vst [vmem:[#allocation33_spill] sm:$0xff] %v4280_v59  ;;  %v4612_v59 = vrot.slane %v4187_v61, %v3779_v34 }
 0x16a   : > { %2201 = vrot.lane.b32.xlu0 %v1176_v5, %s3618_s2  ;;  %2199 = vrot.lane.b32.xlu1 %v1078_v3, %s3618_s2  ;;  %v1666_v3 = vcombine.high %v1656_v13, %v5988_v30  ;;  %v389_v13 = vrot.slane %v375_v29, %v3782_v35  ;;  %v865_v29 = vcombine.high %v4140_v57, %v5988_v30 }
 0x16b   : > { %v1159_v57 = vcombine.high %v4161_v39, %v5988_v30 }
 0x16c   : > { %v4286_v0 = vpop.permute.xlu1 %1959  ;;  %v4288_v31 = vpop.permute.xlu0 %1993 }
 0x16d   : > { %5996 = vst [vmem:[#allocation34_spill] sm:$0xff] %v4286_v0  ;;  %5997 = vst [vmem:[#allocation35_spill] sm:$0xff] %v4288_v31 }
 0x16e   : > { %2205 = vrot.lane.b32.xlu0 %v1372_v4, %s3618_s2  ;;  %2203 = vrot.lane.b32.xlu1 %v1274_v36, %s3618_s2  ;;  %v571_v36 = vcombine.high %v4101_v55, %v5988_v30 }
 0x170   : > { %v4294_v50 = vpop.permute.xlu1 %1995  ;;  %v4296_v5 = vpop.permute.xlu0 %1997 }
 0x171   : > { %5998 = vst [vmem:[#allocation36_spill] sm:$0xff] %v4294_v50  ;;  %5999 = vst [vmem:[#allocation37_spill] sm:$0xff] %v4296_v5  ;;  %v4594_v5 = vrot.slane %v4133_v58, %v3779_v34  ;;  %v4598_v50 = vrot.slane %v4165_v37, %v3779_v34 }
 0x172   : > { %2209 = vrot.lane.b32.xlu0 %v1568_v53, %s3618_s2  ;;  %2207 = vrot.lane.b32.xlu1 %v1470_v24, %s3618_s2  ;;  %v669_v24 = vcombine.high %v4116_v49, %v5988_v30  ;;  %v963_v49 = vcombine.high %v4145_v62, %v5988_v30 }
 0x173   : > { %v1690_v31 = vrot.slane %v4594_v5, %v3782_v35  ;;  %v1788_v0 = vrot.slane %v4598_v50, %v3782_v35 }
 0x174   : > { %v4304_v4 = vpop.permute.xlu1 %1999  ;;  %v4306_v21 = vpop.permute.xlu0 %2001 }
 0x175   : > { %6000 = vst [vmem:[#allocation38_spill] sm:$0xff] %v4304_v4  ;;  %6001 = vst [vmem:[#allocation39_spill] sm:$0xff] %v4306_v21 }
 0x176   : > { %2213 = vrot.lane.b32.xlu0 %v1764_v33, %s3618_s2  ;;  %2211 = vrot.lane.b32.xlu1 %v1666_v3, %s3618_s2  ;;  %v585_v33 = vrot.slane %v571_v36, %v3782_v35  ;;  %v487_v3 = vrot.slane %v473_v17, %v3782_v35  ;;  %v683_v36 = vrot.slane %v669_v24, %v3782_v35 }
 0x177   : > { %v1061_v17 = vcombine.high %v4156_v32, %v5988_v30  ;;  %v1257_v24 = vcombine.high %v4174_v10, %v5988_v30  ;;  %v1355_v32 = vcombine.high %v4179_v14, %v5988_v30  ;;  %v1551_v10 = vcombine.high %v4197_v22, %v5988_v30 }
 0x178   : > { %v4315_v53 = vpop.permute.xlu1 %2003  ;;  %v4317_v43 = vpop.permute.xlu0 %2005 }
 0x179   : > { %6002 = vst [vmem:[#allocation40_spill] sm:$0xff] %v4315_v53  ;;  %6003 = vst [vmem:[#allocation41_spill] sm:$0xff] %v4317_v43  ;;  %v4576_v43 = vrot.slane %v4080_v28, %v3779_v34  ;;  %v4580_v53 = vrot.slane %v4105_v23, %v3779_v34 }
 0x17a   : > { %2249 = vrot.lane.b32.xlu0 %v389_v13, %s3619_s5  ;;  %2215 = vrot.lane.b32.xlu1 %v1862_v11, %s3618_s2  ;;  %s5884_s2 = scalar_lea.hbm %s5938_s1, %s3410_s4 }
 0x17b   : > { %v1494_v21 = vrot.slane %v4576_v43, %v3782_v35  ;;  %v1592_v4 = vrot.slane %v4580_v53, %v3782_v35 }
 0x17c   : > { %v4326_v55 = vpop.permute.xlu1 %2007  ;;  %v4328_v60 = vpop.permute.xlu0 %2009 }
 0x17d   : > { %6004 = vst [vmem:[#allocation42_spill] sm:$0xff] %v4326_v55  ;;  %6005 = vst [vmem:[#allocation43_spill] sm:$0xff] %v4328_v60  ;;  %v781_v60 = vrot.slane %v767_v19, %v3782_v35  ;;  %v879_v19 = vrot.slane %v865_v29, %v3782_v35  ;;  %v1453_v29 = vcombine.high %v4192_v18, %v5988_v30 }
 0x17e   : > { %2253 = vrot.lane.b32.xlu0 %v585_v33, %s3619_s5  ;;  %2251 = vrot.lane.b32.xlu1 %v487_v3, %s3619_s5  ;;  %v1747_v18 = vcombine.high %v4213_v46, %v5988_v30 }
 0x180   : > { %v4338_v11 = vpop.permute.xlu1 %2011  ;;  %v4340_v47 = vpop.permute.xlu0 %2013  ;;  %v1761_v46 = vrot.slane %v1747_v18, %v3782_v35 }
 0x181   : > { %6006 = vst [vmem:[#allocation44_spill] sm:$0xff] %v4338_v11  ;;  %6007 = vst [vmem:[#allocation45_spill] sm:$0xff] %v4340_v47  ;;  %v977_v47 = vrot.slane %v963_v49, %v3782_v35  ;;  %v1075_v49 = vrot.slane %v1061_v17, %v3782_v35  ;;  %v1649_v17 = vcombine.high %v4210_v26, %v5988_v30 }
 0x182   : > { %2257 = vrot.lane.b32.xlu0 %v781_v60, %s3619_s5  ;;  %2255 = vrot.lane.b32.xlu1 %v683_v36, %s3619_s5 }
 0x184   : > { %v4350_v55 = vpop.permute.xlu1 %2015  ;;  %v4352_v62 = vpop.permute.xlu0 %2017 }
 0x185   : > { %6008 = vst [vmem:[#allocation46_spill] sm:$0xff] %v4350_v55  ;;  %6009 = vst [vmem:[#allocation47_spill] sm:$0xff] %v4352_v62  ;;  %v1173_v62 = vrot.slane %v1159_v57, %v3782_v35  ;;  %v1271_v57 = vrot.slane %v1257_v24, %v3782_v35  ;;  %v1845_v24 = vcombine.high %v4228_v51, %v5988_v30 }
 0x186   : > { %2261 = vrot.lane.b32.xlu0 %v977_v47, %s3619_s5  ;;  %2259 = vrot.lane.b32.xlu1 %v879_v19, %s3619_s5  ;;  %v393_v51 = vcombine.high %v389_v13, %v5988_v30 }
 0x188   : > { %v4362_v11 = vpop.permute.xlu1 %2019  ;;  %v4364_v39 = vpop.permute.xlu0 %2021 }
 0x189   : > { %6010 = vst [vmem:[#allocation48_spill] sm:$0xff] %v4362_v11  ;;  %6011 = vst [vmem:[#allocation49_spill] sm:$0xff] %v4364_v39  ;;  %v1369_v39 = vrot.slane %v1355_v32, %v3782_v35  ;;  %v1467_v32 = vrot.slane %v1453_v29, %v3782_v35 }
 0x18a   : > { %2265 = vrot.lane.b32.xlu0 %v1173_v62, %s3619_s5  ;;  %2263 = vrot.lane.b32.xlu1 %v1075_v49, %s3619_s5 }
 0x18c   : > { %v4374_v55 = vpop.permute.xlu1 %2023  ;;  %v4376_v14 = vpop.permute.xlu0 %2057 }
 0x18d   : > { %6012 = vst [vmem:[#allocation50_spill] sm:$0xff] %v4374_v55  ;;  %6013 = vst [vmem:[#allocation51_spill] sm:$0xff] %v4376_v14  ;;  %v1565_v14 = vrot.slane %v1551_v10, %v3782_v35 }
 0x18e   : > { %2269 = vrot.lane.b32.xlu0 %v1369_v39, %s3619_s5  ;;  %2267 = vrot.lane.b32.xlu1 %v1271_v57, %s3619_s5 }
 0x190   : > { %v4386_v11 = vpop.permute.xlu1 %2059  ;;  %v4388_v22 = vpop.permute.xlu0 %2061 }
 0x191   : > { %6014 = vst [vmem:[#allocation52_spill] sm:$0xff] %v4386_v11  ;;  %6015 = vst [vmem:[#allocation53_spill] sm:$0xff] %v4388_v22  ;;  %v1663_v11 = vrot.slane %v1649_v17, %v3782_v35  ;;  %v1859_v22 = vrot.slane %v1845_v24, %v3782_v35 }
 0x192   : > { %2273 = vrot.lane.b32.xlu0 %v1565_v14, %s3619_s5  ;;  %2271 = vrot.lane.b32.xlu1 %v1467_v32, %s3619_s5 }
 0x194   : > { %v4396_v55 = vpop.permute.xlu1 %2063  ;;  %v4398_v26 = vpop.permute.xlu0 %2065 }
 0x195   : > { %6016 = vst [vmem:[#allocation54_spill] sm:$0xff] %v4396_v55  ;;  %6017 = vst [vmem:[#allocation55_spill] sm:$0xff] %v4398_v26  ;;  %v491_v26 = vcombine.high %v487_v3, %v5988_v30  ;;  %v589_v55 = vcombine.high %v585_v33, %v5988_v30  ;;  %v883_v33 = vcombine.high %v879_v19, %v5988_v30 }
 0x196   : > { %2277 = vrot.lane.b32.xlu0 %v1761_v46, %s3619_s5  ;;  %2275 = vrot.lane.b32.xlu1 %v1663_v11, %s3619_s5 }
 0x198   : > { %v4404_v29 = vpop.permute.xlu1 %2067  ;;  %v4406_v10 = vpop.permute.xlu0 %2069 }
 0x199   : > { %6018 = vst [vmem:[#allocation56_spill] sm:$0xff] %v4404_v29  ;;  %6019 = vst [vmem:[#allocation57_spill] sm:$0xff] %v4406_v10  ;;  %v687_v10 = vcombine.high %v683_v36, %v5988_v30 }
 0x19a   : > { %2279 = vrot.lane.b32.xlu1 %v1859_v22, %s3619_s5  ;;  %2313 = vrot.lane.b32.xlu0 %v393_v51, %s3620_s12  ;;  %v785_v51 = vcombine.high %v781_v60, %v5988_v30  ;;  %v1079_v60 = vcombine.high %v1075_v49, %v5988_v30  ;;  %s3286_s5 = scalar_lea.sflag [#allocation4], %s3752_s26 }
 0x19c   : > { %v4412_v18 = vpop.permute.xlu1 %2071  ;;  %v4414_v17 = vpop.permute.xlu0 %2073 }
 0x19d   : > { %6020 = vst [vmem:[#allocation58_spill] sm:$0xff] %v4412_v18  ;;  %6021 = vst [vmem:[#allocation59_spill] sm:$0xff] %v4414_v17 }
 0x19e   : > { %2315 = vrot.lane.b32.xlu1 %v491_v26, %s3620_s12  ;;  %2317 = vrot.lane.b32.xlu0 %v589_v55, %s3620_s12  ;;  %v981_v55 = vcombine.high %v977_v47, %v5988_v30  ;;  %v1275_v47 = vcombine.high %v1271_v57, %v5988_v30  ;;  %v4462_v57 = vrot.slane %v3804_v42, %v3779_v34 }
 0x1a0   : > { %v4420_v24 = vpop.permute.xlu1 %2075  ;;  %v4422_v13 = vpop.permute.xlu0 %2077 }
 0x1a1   : > { %6022 = vst [vmem:[#allocation60_spill] sm:$0xff] %v4420_v24  ;;  %6023 = vst [vmem:[#allocation61_spill] sm:$0xff] %v4422_v13  ;;  %v4562_v24 = vrot.slane %v4070_v54, %v3779_v34 }
 0x1a2   : > { %2319 = vrot.lane.b32.xlu1 %v687_v10, %s3620_s12  ;;  %2321 = vrot.lane.b32.xlu0 %v785_v51, %s3620_s12  ;;  %v1177_v10 = vcombine.high %v1173_v62, %v5988_v30  ;;  %v1471_v62 = vcombine.high %v1467_v32, %v5988_v30  ;;  %v4478_v32 = vrot.slane %v3974_v63, %v3779_v34 }
 0x1a3   : > { %v1396_v29 = vrot.slane %v4562_v24, %v3782_v35 }
 0x1a4   : > { %v4428_v17 = vpop.permute.xlu1 %2079  ;;  %v4430_v3 = vpop.permute.xlu0 %2081 }
 0x1a5   : > { %6024 = vst [vmem:[#allocation62_spill] sm:$0xff] %v4428_v17  ;;  %6025 = vst [vmem:[#allocation63_spill] sm:$0xff] %v4430_v3  ;;  %v4544_v3 = vrot.slane %v4054_v15, %v3779_v34 }
 0x1a6   : > { %2323 = vrot.lane.b32.xlu1 %v883_v33, %s3620_s12  ;;  %2325 = vrot.lane.b32.xlu0 %v981_v55, %s3620_s12  ;;  %v1373_v33 = vcombine.high %v1369_v39, %v5988_v30 }
 0x1a7   : > { %v1200_v13 = vrot.slane %v4544_v3, %v3782_v35 }
 0x1a8   : > { %v4436_v26 = vpop.permute.xlu1 %2083  ;;  %v4438_v36 = vpop.permute.xlu0 %2085 }
 0x1a9   : > { %6026 = vst [vmem:[#allocation64_spill] sm:$0xff] %v4436_v26  ;;  %6027 = vst [vmem:[#allocation65_spill] sm:$0xff] %v4438_v36  ;;  %v4540_v26 = vrot.slane %v4046_v7, %v3779_v34  ;;  %v4558_v36 = vrot.slane %v4062_v27, %v3779_v34 }
 0x1aa   : > { %2327 = vrot.lane.b32.xlu1 %v1079_v60, %s3620_s12  ;;  %2329 = vrot.lane.b32.xlu0 %v1177_v10, %s3620_s12  ;;  %v1569_v60 = vcombine.high %v1565_v14, %v5988_v30  ;;  %v4474_v14 = vrot.slane %v4462_v57, %v3782_v35 }
 0x1ab   : > { %v1102_v17 = vrot.slane %v4540_v26, %v3782_v35  ;;  %v1298_v18 = vrot.slane %v4558_v36, %v3782_v35 }
 0x1ac   : > { %v4444_v51 = vpop.permute.xlu1 %2087  ;;  %v4446_v19 = vpop.permute.xlu0 %2121  ;;  %v439_v1 = vcombine.high %v4474_v14, %v5988_v30 }
 0x1ad   : > { %6028 = vst [vmem:[#allocation66_spill] sm:$0xff] %v4444_v51  ;;  %6029 = vst [vmem:[#allocation67_spill] sm:$0xff] %v4446_v19 }
 0x1ae   : > { %2331 = vrot.lane.b32.xlu1 %v1275_v47, %s3620_s12  ;;  %2333 = vrot.lane.b32.xlu0 %v1373_v33, %s3620_s12  ;;  %v1667_v47 = vcombine.high %v1663_v11, %v5988_v30  ;;  %v1765_v33 = vcombine.high %v1761_v46, %v5988_v30  ;;  %v1863_v46 = vcombine.high %v1859_v22, %v5988_v30 }
 0x1af   : > { %v4506_v22 = vrot.slane %v4017_v16, %v3779_v34 }
 0x1b0   : > { %v4452_v55 = vpop.permute.xlu1 %2123  ;;  %v4454_v49 = vpop.permute.xlu0 %2125 }
 0x1b1   : > { %6030 = vst [vmem:[#allocation68_spill] sm:$0xff] %v4452_v55  ;;  %6031 = vst [vmem:[#allocation69_spill] sm:$0xff] %v4454_v49  ;;  %v4522_v49 = vrot.slane %v4027_v2, %v3779_v34 }
 0x1b2   : > { %2335 = vrot.lane.b32.xlu1 %v1471_v62, %s3620_s12  ;;  %2337 = vrot.lane.b32.xlu0 %v1569_v60, %s3620_s12  ;;  %v4482_v62 = vrot.slane %v3990_v38, %v3779_v34 }
 0x1b3   : > { %v906_v19 = vrot.slane %v4522_v49, %v3782_v35 }
 0x1b4   : > { %v4464_v39 = vpop.permute.xlu1 %2127  ;;  %v4466_v10 = vpop.permute.xlu0 %2129 }
 0x1b5   : > { %6032 = vst [vmem:[#allocation70_spill] sm:$0xff] %v4464_v39  ;;  %6033 = vst [vmem:[#allocation71_spill] sm:$0xff] %v4466_v10  ;;  %v808_v39 = vrot.slane %v4506_v22, %v3782_v35 }
 0x1b6   : > { %2339 = vrot.lane.b32.xlu1 %v1667_v47, %s3620_s12  ;;  %2341 = vrot.lane.b32.xlu0 %v1765_v33, %s3620_s12  ;;  %v4494_v47 = vrot.slane %v4478_v32, %v3782_v35  ;;  %v4498_v33 = vrot.slane %v4482_v62, %v3782_v35 }
 0x1b8   : > { %v4484_v60 = vpop.permute.xlu1 %2131  ;;  %v4486_v11 = vpop.permute.xlu0 %2133  ;;  %v537_v9 = vcombine.high %v4494_v47, %v5988_v30 }
 0x1b9   : > { %6034 = vst [vmem:[#allocation72_spill] sm:$0xff] %v4484_v60  ;;  %6035 = vst [vmem:[#allocation73_spill] sm:$0xff] %v4486_v11  ;;  %v4502_v60 = vrot.slane %v4002_v45, %v3779_v34 }
 0x1ba   : > { %2343 = vrot.lane.b32.xlu1 %v1863_v46, %s3620_s12  ;;  %2377 = vrot.lane.b32.xlu0 %v4474_v14, %s3621_s13  ;;  %s3629_s12 = smov [#allocation5]  }
 0x1bb   : > { %v710_v10 = vrot.slane %v4502_v60, %v3782_v35 }
 0x1bc   : > { %v4508_v46 = vpop.permute.xlu1 %2135  ;;  %v4510_v11 = vpop.permute.xlu0 %2137 }
 0x1bd   : > { %6036 = vst [vmem:[#allocation74_spill] sm:$0xff] %v4508_v46  ;;  %6037 = vst [vmem:[#allocation75_spill] sm:$0xff] %v4510_v11  ;;  %v4526_v46 = vrot.slane %v4038_v8, %v3779_v34 }
 0x1be   : > { %2379 = vrot.lane.b32.xlu1 %v4494_v47, %s3621_s13  ;;  %2381 = vrot.lane.b32.xlu0 %v4498_v33, %s3621_s13 }
 0x1bf   : > { %v1004_v51 = vrot.slane %v4526_v46, %v3782_v35 }
 0x1c0   : > { %v4528_v11 = vpop.permute.xlu1 %2139  ;;  %v4530_v55 = vpop.permute.xlu0 %2141 }
 0x1c1   : > { %6038 = vst [vmem:[#allocation76_spill] sm:$0xff] %v4528_v11  ;;  %6039 = vst [vmem:[#allocation77_spill] sm:$0xff] %v4530_v55 }
 0x1c2   : > { %2383 = vrot.lane.b32.xlu1 %v710_v10, %s3621_s13  ;;  %2385 = vrot.lane.b32.xlu0 %v808_v39, %s3621_s13 }
 0x1c4   : > { %v4546_v11 = vpop.permute.xlu1 %2143  ;;  %v4548_v55 = vpop.permute.xlu0 %2145 }
 0x1c5   : > { %6040 = vst [vmem:[#allocation78_spill] sm:$0xff] %v4546_v11  ;;  %6041 = vst [vmem:[#allocation79_spill] sm:$0xff] %v4548_v55 }
 0x1c6   : > { %2387 = vrot.lane.b32.xlu1 %v906_v19, %s3621_s13  ;;  %2389 = vrot.lane.b32.xlu0 %v1004_v51, %s3621_s13 }
 0x1c8   : > { %v4564_v11 = vpop.permute.xlu1 %2147  ;;  %v4566_v55 = vpop.permute.xlu0 %2149 }
 0x1c9   : > { %6042 = vst [vmem:[#allocation80_spill] sm:$0xff] %v4564_v11  ;;  %6043 = vst [vmem:[#allocation81_spill] sm:$0xff] %v4566_v55 }
 0x1ca   : > { %2391 = vrot.lane.b32.xlu1 %v1102_v17, %s3621_s13  ;;  %2393 = vrot.lane.b32.xlu0 %v1200_v13, %s3621_s13 }
 0x1cc   : > { %v4582_v11 = vpop.permute.xlu1 %2151  ;;  %v4584_v55 = vpop.permute.xlu0 %2185 }
 0x1cd   : > { %6044 = vst [vmem:[#allocation82_spill] sm:$0xff] %v4582_v11  ;;  %6045 = vst [vmem:[#allocation83_spill] sm:$0xff] %v4584_v55 }
 0x1ce   : > { %2395 = vrot.lane.b32.xlu1 %v1298_v18, %s3621_s13  ;;  %2397 = vrot.lane.b32.xlu0 %v1396_v29, %s3621_s13 }
 0x1d0   : > { %v4600_v11 = vpop.permute.xlu1 %2187  ;;  %v4602_v55 = vpop.permute.xlu0 %2189 }
 0x1d1   : > { %6046 = vst [vmem:[#allocation84_spill] sm:$0xff] %v4600_v11  ;;  %6047 = vst [vmem:[#allocation85_spill] sm:$0xff] %v4602_v55  ;;  %v1886_v55 = vrot.slane %v4612_v59, %v3782_v35 }
 0x1d2   : > { %2399 = vrot.lane.b32.xlu1 %v1494_v21, %s3621_s13  ;;  %2401 = vrot.lane.b32.xlu0 %v1592_v4, %s3621_s13 }
 0x1d4   : > { %v4614_v20 = vpop.permute.xlu1 %2191  ;;  %v4616_v56 = vpop.permute.xlu0 %2193 }
 0x1d5   : > { %6048 = vst [vmem:[#allocation86_spill] sm:$0xff] %v4614_v20  ;;  %6049 = vst [vmem:[#allocation87_spill] sm:$0xff] %v4616_v56 }
 0x1d6   : > { %2403 = vrot.lane.b32.xlu1 %v1690_v31, %s3621_s13  ;;  %2405 = vrot.lane.b32.xlu0 %v1788_v0, %s3621_s13 }
 0x1d8   : > { %v4622_v11 = vpop.permute.xlu1 %2195  ;;  %v4624_v52 = vpop.permute.xlu0 %2197 }
 0x1d9   : > { %6050 = vst [vmem:[#allocation88_spill] sm:$0xff] %v4622_v11  ;;  %6051 = vst [vmem:[#allocation89_spill] sm:$0xff] %v4624_v52  ;;  %v635_v11 = vcombine.high %v4498_v33, %v5988_v30 }
 0x1da   : > { %2407 = vrot.lane.b32.xlu1 %v1886_v55, %s3621_s13  ;;  %2441 = vrot.lane.b32.xlu0 %v439_v1, %s3622_s15  ;;  %v733_v1 = vcombine.high %v710_v10, %v5988_v30  ;;  %s3528_s13 = sshll.u32 %s3629_s12, 4  ;;  %s3529_s13 = int_to_ptr.vmem [resolvable:$false] %s3528_s13 }
 0x1db   : > { %p3531_p10 = scmp.lt.s32.totalorder %s5886_s18, %s3529_s13 }
 0x1dc   : > { %v4630_v56 = vpop.permute.xlu1 %2199  ;;  %v4632_v20 = vpop.permute.xlu0 %2201 }
 0x1dd   : > { %6052 = vst [vmem:[#allocation90_spill] sm:$0xff] %v4630_v56  ;;  %6053 = vst [vmem:[#allocation91_spill] sm:$0xff] %v4632_v20  ;;  %v831_v56 = vcombine.high %v808_v39, %v5988_v30  ;;  %v1125_v39 = vcombine.high %v1102_v17, %v5988_v30 }
 0x1de   : > { %2443 = vrot.lane.b32.xlu1 %v537_v9, %s3622_s15  ;;  %2445 = vrot.lane.b32.xlu0 %v635_v11, %s3622_s15  ;;  %v929_v9 = vcombine.high %v906_v19, %v5988_v30  ;;  %v1027_v11 = vcombine.high %v1004_v51, %v5988_v30  ;;  %v1321_v51 = vcombine.high %v1298_v18, %v5988_v30 }
 0x1df   : > { %v409_v18 = vcombine.high %v4462_v57, %v5988_v30 }
 0x1e0   : > { %v4640_v14 = vpop.permute.xlu1 %2203  ;;  %v4642_v52 = vpop.permute.xlu0 %2205 }
 0x1e1   : > { %6054 = vst [vmem:[#allocation92_spill] sm:$0xff] %v4640_v14  ;;  %6055 = vst [vmem:[#allocation93_spill] sm:$0xff] %v4642_v52 }
 0x1e2   : > { %2447 = vrot.lane.b32.xlu1 %v733_v1, %s3622_s15  ;;  %2449 = vrot.lane.b32.xlu0 %v831_v56, %s3622_s15  ;;  %v1223_v56 = vcombine.high %v1200_v13, %v5988_v30  ;;  %v1517_v13 = vcombine.high %v1494_v21, %v5988_v30  ;;  %v605_v21 = vcombine.high %v4482_v62, %v5988_v30 }
 0x1e4   : > { %v4648_v47 = vpop.permute.xlu1 %2207  ;;  %v4650_v20 = vpop.permute.xlu0 %2209 }
 0x1e5   : > { %6056 = vst [vmem:[#allocation94_spill] sm:$0xff] %v4648_v47  ;;  %6057 = vst [vmem:[#allocation95_spill] sm:$0xff] %v4650_v20 }
 0x1e6   : > { %2451 = vrot.lane.b32.xlu1 %v929_v9, %s3622_s15  ;;  %2453 = vrot.lane.b32.xlu0 %v1027_v11, %s3622_s15  ;;  %v1419_v9 = vcombine.high %v1396_v29, %v5988_v30 }
 0x1e8   : > { %v4656_v33 = vpop.permute.xlu1 %2211  ;;  %v4658_v10 = vpop.permute.xlu0 %2213 }
 0x1e9   : > { %6058 = vst [vmem:[#allocation96_spill] sm:$0xff] %v4656_v33 }
 0x1ea   : > { %2455 = vrot.lane.b32.xlu1 %v1125_v39, %s3622_s15  ;;  %2457 = vrot.lane.b32.xlu0 %v1223_v56, %s3622_s15  ;;  %v1615_v39 = vcombine.high %v1592_v4, %v5988_v30  ;;  %v507_v4 = vcombine.high %v4478_v32, %v5988_v30  ;;  %v801_v32 = vcombine.high %v4506_v22, %v5988_v30 }
 0x1ec   : > { %v4664_v1 = vpop.permute.xlu1 %2215  ;;  %v4666_v19 = vpop.permute.xlu0 %2249 }
 0x1ee   : > { %2459 = vrot.lane.b32.xlu1 %v1321_v51, %s3622_s15  ;;  %2461 = vrot.lane.b32.xlu0 %v1419_v9, %s3622_s15  ;;  %v1713_v51 = vcombine.high %v1690_v31, %v5988_v30  ;;  %v1811_v9 = vcombine.high %v1788_v0, %v5988_v30  ;;  %v423_v31 = vrot.slane %v409_v18, %v3782_v35 }
 0x1ef   : > { %v703_v0 = vcombine.high %v4502_v60, %v5988_v30  ;;  %v899_v18 = vcombine.high %v4522_v49, %v5988_v30  ;;  %v997_v60 = vcombine.high %v4526_v46, %v5988_v30  ;;  %v1193_v49 = vcombine.high %v4544_v3, %v5988_v30 }
 0x1f0   : > { %v4672_v11 = vpop.permute.xlu1 %2251  ;;  %v4674_v17 = vpop.permute.xlu0 %2253 }
 0x1f1   : > { %v717_v33 = vrot.slane %v703_v0, %v3782_v35  ;;  %v913_v47 = vrot.slane %v899_v18, %v3782_v35  ;;  %v1011_v0 = vrot.slane %v997_v60, %v3782_v35  ;;  %v1207_v18 = vrot.slane %v1193_v49, %v3782_v35 }
 0x1f2   : > { %2463 = vrot.lane.b32.xlu1 %v1517_v13, %s3622_s15  ;;  %2465 = vrot.lane.b32.xlu0 %v1615_v39, %s3622_s15  ;;  %v1909_v39 = vcombine.high %v1886_v55, %v5988_v30  ;;  %v619_v55 = vrot.slane %v605_v21, %v3782_v35  ;;  %v1095_v21 = vcombine.high %v4540_v26, %v5988_v30 }
 0x1f3   : > { %v1389_v26 = vcombine.high %v4562_v24, %v5988_v30  ;;  %v1487_v60 = vcombine.high %v4576_v43, %v5988_v30  ;;  %v1683_v49 = vcombine.high %v4594_v5, %v5988_v30  ;;  %v1781_v43 = vcombine.high %v4598_v50, %v5988_v30 }
 0x1f4   : > { %v4682_v29 = vpop.permute.xlu1 %2255  ;;  %v4684_v56 = vpop.permute.xlu0 %2257 }
 0x1f5   : > { %6059 = vst [vmem:[#allocation97_spill] sm:$0xff] %v4682_v29  ;;  %6060 = vst [vmem:[#allocation98_spill] sm:$0xff] %v4684_v56  ;;  %v1501_v52 = vrot.slane %v1487_v60, %v3782_v35  ;;  %v1697_v50 = vrot.slane %v1683_v49, %v3782_v35 }
 0x1f6   : > { %2467 = vrot.lane.b32.xlu1 %v1713_v51, %s3622_s15  ;;  %2469 = vrot.lane.b32.xlu0 %v1811_v9, %s3622_s15  ;;  %v521_v9 = vrot.slane %v507_v4, %v3782_v35  ;;  %v815_v4 = vrot.slane %v801_v32, %v3782_v35  ;;  %v1291_v32 = vcombine.high %v4558_v36, %v5988_v30 }
 0x1f7   : > { %v1585_v36 = vcombine.high %v4580_v53, %v5988_v30 }
 0x1f8   : > { %v4694_v13 = vpop.permute.xlu1 %2259  ;;  %v4696_v57 = vpop.permute.xlu0 %2261 }
 0x1f9   : > { %6061 = vst [vmem:[#allocation99_spill] sm:$0xff] %v4694_v13  ;;  %6062 = vst [vmem:[#allocation100_spill] sm:$0xff] %v4696_v57  ;;  %v538_v57 = vcombine.high %v521_v9, %v5988_v30  ;;  %v636_v13 = vcombine.high %v619_v55, %v5988_v30 }
 0x1fa   : > { %2471 = vrot.lane.b32.xlu1 %v1909_v39, %s3622_s15  ;;  %2505 = vrot.lane.b32.xlu0 %v423_v31, %s3623_s16  ;;  %s3530_s15 = scalar_lea.vmem %s3529_s13, 1024 }
 0x1fb   : > { %p3532_p12 = scmp.lt.s32.totalorder %s3530_s15, %s3524_s9 }
 0x1fc   : > { %v4706_v62 = vpop.permute.xlu1 %2263  ;;  %v4708_v51 = vpop.permute.xlu0 %2265 }
 0x1fd   : > { %6063 = vst [vmem:[#allocation101_spill] sm:$0xff] %v4706_v62  ;;  %6064 = vst [vmem:[#allocation102_spill] sm:$0xff] %v4708_v51  ;;  %v1795_v51 = vrot.slane %v1781_v43, %v3782_v35  ;;  %p3533_p1 = por %p3532_p12, %p3531_p10 }
 0x1fe   : > { %2507 = vrot.lane.b32.xlu1 %v521_v9, %s3623_s16  ;;  %2509 = vrot.lane.b32.xlu0 %v619_v55, %s3623_s16 }
 0x1ff   : > { %p3534_p3 = pnand %p3533_p1, %p3527_p13 }
 0x200   : > { %v4718_v39 = vpop.permute.xlu1 %2267  ;;  %v4720_v22 = vpop.permute.xlu0 %2269 }
 0x201   : > { %6065 = vst [vmem:[#allocation103_spill] sm:$0xff] %v4718_v39  ;;  %6066 = vst [vmem:[#allocation104_spill] sm:$0xff] %v4720_v22 }
 0x202   : > { %2511 = vrot.lane.b32.xlu1 %v717_v33, %s3623_s16  ;;  %2513 = vrot.lane.b32.xlu0 %v815_v4, %s3623_s16 }
 0x204   : > { %v4730_v20 = vpop.permute.xlu1 %2271  ;;  %v4732_v46 = vpop.permute.xlu0 %2273 }
 0x205   : > { %6067 = vst [vmem:[#allocation105_spill] sm:$0xff] %v4730_v20  ;;  %6068 = vst [vmem:[#allocation106_spill] sm:$0xff] %v4732_v46  ;;  %v1109_v46 = vrot.slane %v1095_v21, %v3782_v35  ;;  %v1403_v21 = vrot.slane %v1389_v26, %v3782_v35  ;;  %v1879_v26 = vcombine.high %v4612_v59, %v5988_v30 }
 0x206   : > { %2515 = vrot.lane.b32.xlu1 %v913_v47, %s3623_s16  ;;  %2517 = vrot.lane.b32.xlu0 %v1011_v0, %s3623_s16  ;;  %v440_v59 = vcombine.high %v423_v31, %v5988_v30 }
 0x207   : > { %v1893_v62 = vrot.slane %v1879_v26, %v3782_v35 }
 0x208   : > { %v4742_v22 = vpop.permute.xlu1 %2275  ;;  %v4744_v3 = vpop.permute.xlu0 %2277 }
 0x209   : > { %6069 = vst [vmem:[#allocation107_spill] sm:$0xff] %v4742_v22  ;;  %v1305_v22 = vrot.slane %v1291_v32, %v3782_v35  ;;  %v1599_v32 = vrot.slane %v1585_v36, %v3782_v35 }
 0x20a   : > { %2519 = vrot.lane.b32.xlu1 %v1109_v46, %s3623_s16  ;;  %2521 = vrot.lane.b32.xlu0 %v1207_v18, %s3623_s16 }
 0x20c   : > { %v4754_v20 = vpop.permute.xlu1 %2279  ;;  %v4756_v24 = vpop.permute.xlu0 %2313 }
 0x20e   : > { %2523 = vrot.lane.b32.xlu1 %v1305_v22, %s3623_s16  ;;  %2525 = vrot.lane.b32.xlu0 %v1403_v21, %s3623_s16 }
 0x210   : > { %v4766_v39 = vpop.permute.xlu1 %2315  ;;  %v4768_v53 = vpop.permute.xlu0 %2317 }
 0x212   : > { %2527 = vrot.lane.b32.xlu1 %v1501_v52, %s3623_s16  ;;  %2529 = vrot.lane.b32.xlu0 %v1599_v32, %s3623_s16 }
 0x214   : > { %v4776_v14 = vpop.permute.xlu1 %2319  ;;  %v4778_v5 = vpop.permute.xlu0 %2321 }
 0x215   : > { %6070 = vst [vmem:[#allocation108_spill] sm:$0xff] %v4776_v14  ;;  %6071 = vst [vmem:[#allocation109_spill] sm:$0xff] %v4778_v5 }
 0x216   : > { %2531 = vrot.lane.b32.xlu1 %v1697_v50, %s3623_s16  ;;  %2533 = vrot.lane.b32.xlu0 %v1795_v51, %s3623_s16 }
 0x218   : > { %v4784_v60 = vpop.permute.xlu1 %2323  ;;  %v4786_v36 = vpop.permute.xlu0 %2325 }
 0x219   : > { %6072 = vst [vmem:[#allocation110_spill] sm:$0xff] %v4784_v60  ;;  %6073 = vst [vmem:[#allocation111_spill] sm:$0xff] %v4786_v36  ;;  %v734_v36 = vcombine.high %v717_v33, %v5988_v30 }
 0x21a   : > { %2535 = vrot.lane.b32.xlu1 %v1893_v62, %s3623_s16  ;;  %2569 = vrot.lane.b32.xlu0 %v440_v59, %s3624_s17  ;;  %v832_v59 = vcombine.high %v815_v4, %v5988_v30  ;;  %v1126_v4 = vcombine.high %v1109_v46, %v5988_v30  ;;  %v394_v46 = vcombine.high %v3804_v42, %v5988_v30 }
 0x21b   : > { %v590_v42 = vcombine.high %v3990_v38, %v5988_v30 }
 0x21c   : > { %v4792_v49 = vpop.permute.xlu1 %2327  ;;  %v4794_v43 = vpop.permute.xlu0 %2329 }
 0x21d   : > { %6074 = vst [vmem:[#allocation112_spill] sm:$0xff] %v4792_v49  ;;  %6075 = vst [vmem:[#allocation113_spill] sm:$0xff] %v4794_v43  ;;  %v4863_v38 = vrot.slane %v590_v42, %v3779_v34 }
 0x21e   : > { %2571 = vrot.lane.b32.xlu1 %v538_v57, %s3624_s17  ;;  %2573 = vrot.lane.b32.xlu0 %v636_v13, %s3624_s17  ;;  %v930_v57 = vcombine.high %v913_v47, %v5988_v30  ;;  %v1028_v13 = vcombine.high %v1011_v0, %v5988_v30  ;;  %v1322_v0 = vcombine.high %v1305_v22, %v5988_v30 }
 0x21f   : > { %v492_v22 = vcombine.high %v3974_v63, %v5988_v30 }
 0x220   : > { %v4800_v26 = vpop.permute.xlu1 %2331  ;;  %v4802_v31 = vpop.permute.xlu0 %2333 }
 0x221   : > { %6076 = vst [vmem:[#allocation114_spill] sm:$0xff] %v4800_v26  ;;  %6077 = vst [vmem:[#allocation115_spill] sm:$0xff] %v4802_v31  ;;  %v4858_v63 = vrot.slane %v492_v22, %v3779_v34 }
 0x222   : > { %2575 = vrot.lane.b32.xlu1 %v734_v36, %s3624_s17  ;;  %2577 = vrot.lane.b32.xlu0 %v832_v59, %s3624_s17  ;;  %v1224_v36 = vcombine.high %v1207_v18, %v5988_v30 }
 0x224   : > { %v4808_v43 = vpop.permute.xlu1 %2335  ;;  %v4810_v9 = vpop.permute.xlu0 %2337 }
 0x225   : > { %6078 = vst [vmem:[#allocation116_spill] sm:$0xff] %v4808_v43  ;;  %6079 = vst [vmem:[#allocation117_spill] sm:$0xff] %v4810_v9 }
 0x226   : > { %2579 = vrot.lane.b32.xlu1 %v930_v57, %s3624_s17  ;;  %2581 = vrot.lane.b32.xlu0 %v1028_v13, %s3624_s17  ;;  %v1420_v57 = vcombine.high %v1403_v21, %v5988_v30  ;;  %v4845_v21 = vrot.slane %v394_v46, %v3779_v34  ;;  %v688_v46 = vcombine.high %v4002_v45, %v5988_v30 }
 0x228   : > { %v4816_v55 = vpop.permute.xlu1 %2339  ;;  %v4818_v33 = vpop.permute.xlu0 %2341  ;;  %v4880_v45 = vrot.slane %v688_v46, %v3779_v34  ;;  %v4899_v46 = vrot.slane %v4863_v38, %v3782_v35 }
 0x229   : > { %6080 = vst [vmem:[#allocation118_spill] sm:$0xff] %v4816_v55  ;;  %v1178_v55 = vcombine.high %v4054_v15, %v5988_v30  ;;  %v1276_v15 = vcombine.high %v4062_v27, %v5988_v30 }
 0x22a   : > { %2583 = vrot.lane.b32.xlu1 %v1126_v4, %s3624_s17  ;;  %2585 = vrot.lane.b32.xlu0 %v1224_v36, %s3624_s17  ;;  %v1518_v4 = vcombine.high %v1501_v52, %v5988_v30  ;;  %v1616_v36 = vcombine.high %v1599_v32, %v5988_v30  ;;  %v1714_v52 = vcombine.high %v1697_v50, %v5988_v30 }
 0x22b   : > { %v1812_v32 = vcombine.high %v1795_v51, %v5988_v30  ;;  %v1910_v51 = vcombine.high %v1893_v62, %v5988_v30  ;;  %v982_v62 = vcombine.high %v4038_v8, %v5988_v30  ;;  %v1080_v8 = vcombine.high %v4046_v7, %v5988_v30 }
 0x22c   : > { %v4824_v59 = vpop.permute.xlu1 %2343  ;;  %v4826_v47 = vpop.permute.xlu0 %2377  ;;  %v4921_v31 = vrot.slane %v4880_v45, %v3782_v35  ;;  %v4952_v27 = vrot.slane %v1276_v15, %v3779_v34 }
 0x22d   : > { %v4932_v7 = vrot.slane %v1080_v8, %v3779_v34 }
 0x22e   : > { %2587 = vrot.lane.b32.xlu1 %v1322_v0, %s3624_s17  ;;  %2589 = vrot.lane.b32.xlu0 %v1420_v57, %s3624_s17  ;;  %v1313_v60 = vrot.slane %v4952_v27, %v3782_v35 }
 0x22f   : > { %v1117_v49 = vrot.slane %v4932_v7, %v3782_v35 }
 0x230   : > { %v4834_v18 = vpop.permute.xlu1 %2379  ;;  %v4836_v13 = vpop.permute.xlu0 %2381 }
 0x231   : > { %6081 = vst [vmem:[#allocation119_spill] sm:$0xff] %v4836_v13 }
 0x232   : > { %2591 = vrot.lane.b32.xlu1 %v1518_v4, %s3624_s17  ;;  %2593 = vrot.lane.b32.xlu0 %v1616_v36, %s3624_s17  ;;  %v786_v4 = vcombine.high %v4017_v16, %v5988_v30  ;;  %v884_v16 = vcombine.high %v4027_v2, %v5988_v30 }
 0x234   : > { %v4849_v0 = vpop.permute.xlu1 %2383  ;;  %v4851_v57 = vpop.permute.xlu0 %2385  ;;  %v4885_v22 = vrot.slane %v786_v4, %v3779_v34  ;;  %v4906_v2 = vrot.slane %v884_v16, %v3779_v34  ;;  %v4911_v4 = vrot.slane %v982_v62, %v3779_v34  ;;  %v4937_v62 = vrot.slane %v1178_v55, %v3779_v34 }
 0x235   : > { %6082 = vst [vmem:[#allocation120_spill] sm:$0xff] %v4849_v0  ;;  %6083 = vst [vmem:[#allocation121_spill] sm:$0xff] %v4851_v57 }
 0x236   : > { %2595 = vrot.lane.b32.xlu1 %v1714_v52, %s3624_s17  ;;  %2597 = vrot.lane.b32.xlu0 %v1812_v32, %s3624_s17  ;;  %v4874_v52 = vrot.slane %v4845_v21, %v3782_v35  ;;  %v4925_v16 = vrot.slane %v4885_v22, %v3782_v35  ;;  %v1019_v8 = vrot.slane %v4911_v4, %v3782_v35 }
 0x237   : > { %v1215_v15 = vrot.slane %v4937_v62, %v3782_v35 }
 0x238   : > { %v4867_v36 = vpop.permute.xlu1 %2387  ;;  %v4869_v50 = vpop.permute.xlu0 %2389 }
 0x239   : > { %6084 = vst [vmem:[#allocation122_spill] sm:$0xff] %v4867_v36  ;;  %6085 = vst [vmem:[#allocation123_spill] sm:$0xff] %v4869_v50 }
 0x23a   : > { %2599 = vrot.lane.b32.xlu1 %v1910_v51, %s3624_s17  ;;  %2633 = vrot.lane.b32.xlu0 %v4874_v52, %s3625_s22  ;;  %v4895_v51 = vrot.slane %v4858_v63, %v3782_v35 }
 0x23c   : > { %v4889_v42 = vpop.permute.xlu1 %2391  ;;  %v4891_v32 = vpop.permute.xlu0 %2393 }
 0x23d   : > { %6086 = vst [vmem:[#allocation124_spill] sm:$0xff] %v4889_v42  ;;  %6087 = vst [vmem:[#allocation125_spill] sm:$0xff] %v4891_v32  ;;  %v921_v32 = vrot.slane %v4906_v2, %v3782_v35 }
 0x23e   : > { %2635 = vrot.lane.b32.xlu1 %v4895_v51, %s3625_s22  ;;  %2637 = vrot.lane.b32.xlu0 %v4899_v46, %s3625_s22 }
 0x240   : > { %v4915_v9 = vpop.permute.xlu1 %2395  ;;  %v4917_v43 = vpop.permute.xlu0 %2397 }
 0x241   : > { %6088 = vst [vmem:[#allocation126_spill] sm:$0xff] %v4915_v9  ;;  %6089 = vst [vmem:[#allocation127_spill] sm:$0xff] %v4917_v43  ;;  %v1374_v43 = vcombine.high %v4070_v54, %v5988_v30  ;;  %v1472_v54 = vcombine.high %v4080_v28, %v5988_v30 }
 0x242   : > { %2639 = vrot.lane.b32.xlu1 %v4921_v31, %s3625_s22  ;;  %2641 = vrot.lane.b32.xlu0 %v4925_v16, %s3625_s22 }
 0x243   : > { %v4957_v55 = vrot.slane %v1374_v43, %v3779_v34  ;;  %v4972_v28 = vrot.slane %v1472_v54, %v3779_v34 }
 0x244   : > { %v4941_v9 = vpop.permute.xlu1 %2399  ;;  %v4943_v26 = vpop.permute.xlu0 %2401 }
 0x245   : > { %6090 = vst [vmem:[#allocation128_spill] sm:$0xff] %v4941_v9  ;;  %6091 = vst [vmem:[#allocation129_spill] sm:$0xff] %v4943_v26  ;;  %v1570_v26 = vcombine.high %v4105_v23, %v5988_v30  ;;  %v1668_v23 = vcombine.high %v4133_v58, %v5988_v30  ;;  %v1411_v54 = vrot.slane %v4957_v55, %v3782_v35 }
 0x246   : > { %2643 = vrot.lane.b32.xlu1 %v921_v32, %s3625_s22  ;;  %2645 = vrot.lane.b32.xlu0 %v1019_v8, %s3625_s22  ;;  %v5005_v5 = vrot.slane %v4972_v28, %v3782_v35 }
 0x247   : > { %v4977_v43 = vrot.slane %v1570_v26, %v3779_v34  ;;  %v4992_v58 = vrot.slane %v1668_v23, %v3779_v34 }
 0x248   : > { %v4961_v9 = vpop.permute.xlu1 %2403  ;;  %v4963_v42 = vpop.permute.xlu0 %2405 }
 0x249   : > { %6092 = vst [vmem:[#allocation130_spill] sm:$0xff] %v4961_v9  ;;  %v1766_v9 = vcombine.high %v4165_v37, %v5988_v30  ;;  %v1864_v37 = vcombine.high %v4187_v61, %v5988_v30  ;;  %v5009_v14 = vrot.slane %v4977_v43, %v3782_v35  ;;  %v5024_v56 = vrot.slane %v4992_v58, %v3782_v35 }
 0x24a   : > { %2647 = vrot.lane.b32.xlu1 %v1117_v49, %s3625_s22  ;;  %2649 = vrot.lane.b32.xlu0 %v1215_v15, %s3625_s22 }
 0x24b   : > { %v4995_v26 = vrot.slane %v1766_v9, %v3779_v34  ;;  %v5016_v61 = vrot.slane %v1864_v37, %v3779_v34 }
 0x24c   : > { %v4981_v50 = vpop.permute.xlu1 %2407  ;;  %v4983_v36 = vpop.permute.xlu0 %2441 }
 0x24d   : > { %v5028_v29 = vrot.slane %v4995_v26, %v3782_v35 }
 0x24e   : > { %2651 = vrot.lane.b32.xlu1 %v1313_v60, %s3625_s22  ;;  %2653 = vrot.lane.b32.xlu0 %v1411_v54, %s3625_s22 }
 0x250   : > { %v4999_v57 = vpop.permute.xlu1 %2443  ;;  %v5001_v0 = vpop.permute.xlu0 %2445 }
 0x251   : > { %6093 = vst [vmem:[#allocation131_spill] sm:$0xff] %v4999_v57  ;;  %6094 = vst [vmem:[#allocation132_spill] sm:$0xff] %v5001_v0 }
 0x252   : > { %2655 = vrot.lane.b32.xlu1 %v5005_v5, %s3625_s22  ;;  %2657 = vrot.lane.b32.xlu0 %v5009_v14, %s3625_s22 }
 0x254   : > { %v5018_v9 = vpop.permute.xlu1 %2447  ;;  %v5020_v23 = vpop.permute.xlu0 %2449 }
 0x255   : > { %6095 = vst [vmem:[#allocation133_spill] sm:$0xff] %v5018_v9  ;;  %6096 = vst [vmem:[#allocation134_spill] sm:$0xff] %v5020_v23  ;;  %v5040_v23 = vrot.slane %v5016_v61, %v3782_v35  ;;  %v441_v9 = vcombine.high %v4874_v52, %v5988_v30 }
 0x256   : > { %2659 = vrot.lane.b32.xlu1 %v5024_v56, %s3625_s22  ;;  %2661 = vrot.lane.b32.xlu0 %v5028_v29, %s3625_s22 }
 0x258   : > { %v5034_v37 = vpop.permute.xlu1 %2451  ;;  %v5036_v34 = vpop.permute.xlu0 %2453 }
 0x259   : > { %6097 = vst [vmem:[#allocation135_spill] sm:$0xff] %v5034_v37  ;;  %6098 = vst [vmem:[#allocation136_spill] sm:$0xff] %v5036_v34  ;;  %v539_v34 = vcombine.high %v4895_v51, %v5988_v30  ;;  %v637_v37 = vcombine.high %v4899_v46, %v5988_v30 }
 0x25a   : > { %2663 = vrot.lane.b32.xlu1 %v5040_v23, %s3625_s22  ;;  %2697 = vrot.lane.b32.xlu0 %v441_v9, %s3626_s23  ;;  %v735_v9 = vcombine.high %v4921_v31, %v5988_v30 }
 0x25c   : > { %v5047_v0 = vpop.permute.xlu1 %2455  ;;  %v5049_v57 = vpop.permute.xlu0 %2457 }
 0x25d   : > { %6099 = vst [vmem:[#allocation137_spill] sm:$0xff] %v5047_v0  ;;  %6100 = vst [vmem:[#allocation138_spill] sm:$0xff] %v5049_v57  ;;  %v833_v57 = vcombine.high %v4925_v16, %v5988_v30  ;;  %v1127_v16 = vcombine.high %v1117_v49, %v5988_v30  ;;  %v1323_v49 = vcombine.high %v1313_v60, %v5988_v30  ;;  %v6132_v0 = vld [vmem:[#allocation17_spill] sm:$0xff] }
 0x25e   : > { %2699 = vrot.lane.b32.xlu1 %v539_v34, %s3626_s23  ;;  %2701 = vrot.lane.b32.xlu0 %v637_v37, %s3626_s23  ;;  %v931_v34 = vcombine.high %v921_v32, %v5988_v30  ;;  %v1029_v37 = vcombine.high %v1019_v8, %v5988_v30  ;;  %v424_v32 = vcombine.high %v4845_v21, %v5988_v30 }
 0x25f   : > { %v522_v8 = vcombine.high %v4858_v63, %v5988_v30  ;;  %v816_v21 = vcombine.high %v4885_v22, %v5988_v30  ;;  %v914_v63 = vcombine.high %v4906_v2, %v5988_v30  ;;  %v1208_v60 = vcombine.high %v4937_v62, %v5988_v30 }
 0x260   : > { %v5057_v52 = vpop.permute.xlu1 %2459  ;;  %v5059_v13 = vpop.permute.xlu0 %2461  ;;  %v1502_v22 = vcombine.high %v4972_v28, %v5988_v30  ;;  %v1600_v2 = vcombine.high %v4977_v43, %v5988_v30  ;;  %v438_v28 = vrot.slane %v424_v32, %v3782_v35  ;;  %v1894_v43 = vcombine.high %v5016_v61, %v5988_v30 }
 0x261   : > { %6101 = vst [vmem:[#allocation139_spill] sm:$0xff] %v5057_v52  ;;  %6102 = vst [vmem:[#allocation140_spill] sm:$0xff] %v5059_v13  ;;  %v6125_v52 = vld [vmem:[#allocation13_spill] sm:$0xff] }
 0x262   : > { %2703 = vrot.lane.b32.xlu1 %v735_v9, %s3626_s23  ;;  %2705 = vrot.lane.b32.xlu0 %v833_v57, %s3626_s23  ;;  %v1225_v57 = vcombine.high %v1215_v15, %v5988_v30  ;;  %v620_v9 = vcombine.high %v4863_v38, %v5988_v30  ;;  %v1421_v15 = vcombine.high %v1411_v54, %v5988_v30 }
 0x263   : > { %v1012_v38 = vcombine.high %v4911_v4, %v5988_v30  ;;  %v1306_v54 = vcombine.high %v4952_v27, %v5988_v30  ;;  %v1698_v4 = vcombine.high %v4992_v58, %v5988_v30  ;;  %v5133_v58 = vrot.slane %v522_v8, %v3782_v35 }
 0x264   : > { %v5067_v51 = vpop.permute.xlu1 %2463  ;;  %v5069_v46 = vpop.permute.xlu0 %2465  ;;  %v5156_v8 = vrot.slane %v1208_v60, %v3782_v35  ;;  %v5176_v60 = vcombine.high %v438_v28, %v5988_v30 }
 0x265   : > { %6103 = vst [vmem:[#allocation141_spill] sm:$0xff] %v5067_v51  ;;  %6104 = vst [vmem:[#allocation142_spill] sm:$0xff] %v5069_v46  ;;  %v5150_v61 = vrot.slane %v1012_v38, %v3782_v35  ;;  %v1813_v38 = vcombine.high %v5028_v29, %v5988_v30  ;;  %v6117_v46 = vld [vmem:[#allocation10_spill] sm:$0xff] }
 0x266   : > { %2707 = vrot.lane.b32.xlu1 %v931_v34, %s3626_s23  ;;  %2709 = vrot.lane.b32.xlu0 %v1029_v37, %s3626_s23  ;;  %6108 = vst [vmem:[#allocation146_spill] sm:$0xff] %v5176_v60 }
 0x268   : > { %v5075_v31 = vpop.permute.xlu1 %2467  ;;  %v5077_v13 = vpop.permute.xlu0 %2469 }
 0x269   : > { %6105 = vst [vmem:[#allocation143_spill] sm:$0xff] %v5075_v31  ;;  %v2875_v31 = vsel %vm2873_vm0, %v3798_v40, %v4217_v12  ;;  %v6119_v40 = vld [vmem:[#allocation11_spill] sm:$0xff] }
 0x26a   : > { %2711 = vrot.lane.b32.xlu1 %v1127_v16, %s3626_s23  ;;  %2713 = vrot.lane.b32.xlu0 %v1225_v57, %s3626_s23  ;;  %v718_v16 = vcombine.high %v4880_v45, %v5988_v30  ;;  %v1110_v57 = vcombine.high %v4932_v7, %v5988_v30  ;;  %v1404_v45 = vcombine.high %v4957_v55, %v5988_v30 }
 0x26b   : > { %v1796_v7 = vcombine.high %v4995_v26, %v5988_v30  ;;  %v1617_v55 = vcombine.high %v5009_v14, %v5988_v30  ;;  %v5136_v26 = vrot.slane %v620_v9, %v3782_v35  ;;  %v5144_v14 = vrot.slane %v816_v21, %v3782_v35 }
 0x26c   : > { %v5089_v34 = vpop.permute.xlu1 %2471  ;;  %v5091_v37 = vpop.permute.xlu0 %2505  ;;  %v5153_v32 = vrot.slane %v1110_v57, %v3782_v35  ;;  %v5159_v9 = vrot.slane %v1306_v54, %v3782_v35  ;;  %v5173_v57 = vrot.slane %v1502_v22, %v3782_v35  ;;  %v5179_v54 = vrot.slane %v1600_v2, %v3782_v35 }
 0x26d   : > { %v5198_v22 = vrot.slane %v1698_v4, %v3782_v35  ;;  %v5202_v2 = vcombine.high %v5144_v14, %v5988_v30  ;;  %v2876_v4 = vsel %vm2873_vm0, %v3820_v48, %v4219_v25  ;;  %v6126_v25 = vld [vmem:[#allocation14_spill] sm:$0xff] }
 0x26e   : > { %2715 = vrot.lane.b32.xlu1 %v1323_v49, %s3626_s23  ;;  %2717 = vrot.lane.b32.xlu0 %v1421_v15, %s3626_s23  ;;  %v1519_v49 = vcombine.high %v5005_v5, %v5988_v30  ;;  %v5139_v15 = vrot.slane %v718_v16, %v3782_v35  ;;  %v5147_v5 = vrot.slane %v914_v63, %v3782_v35 }
 0x26f   : > { %v5162_v16 = vrot.slane %v1404_v45, %v3782_v35  ;;  %v1715_v63 = vcombine.high %v5024_v56, %v5988_v30  ;;  %v5183_v45 = vcombine.high %v5133_v58, %v5988_v30  ;;  %v1911_v56 = vcombine.high %v5040_v23, %v5988_v30  ;;  %6112 = vst [vmem:[#allocation150_spill] sm:$0xff] %v5198_v22 }
 0x270   : > { %v5121_v62 = vpop.permute.xlu1 %2507  ;;  %v5123_v27 = vpop.permute.xlu0 %2509  ;;  %v5191_v29 = vcombine.high %v5139_v15, %v5988_v30  ;;  %6113 = vst [vmem:[#allocation151_spill] sm:$0xff] %v5202_v2  ;;  %v5214_v23 = vrot.slane %v1894_v43, %v3782_v35  ;;  %v6118_v2 = vld [vmem:[#allocation24_spill] sm:$0xff]  ;;  %v6124_v43 = vld [vmem:[#allocation26_spill] sm:$0xff] }
 0x271   : > { %6109 = vst [vmem:[#allocation147_spill] sm:$0xff] %v5183_v45  ;;  %v2878_v12 = vsel %vm2873_vm0, %v6119_v40, %v6118_v2  ;;  %v2880_v48 = vsel %vm2873_vm0, %v6125_v52, %v6124_v43  ;;  %v6129_v40 = vld [vmem:[#allocation28_spill] sm:$0xff]  ;;  %v6135_v43 = vld [vmem:[#allocation31_spill] sm:$0xff] }
 0x272   : > { %2719 = vrot.lane.b32.xlu1 %v1519_v49, %s3626_s23  ;;  %2721 = vrot.lane.b32.xlu0 %v1617_v55, %s3626_s23  ;;  %v5187_v55 = vcombine.high %v5136_v26, %v5988_v30  ;;  %6111 = vst [vmem:[#allocation149_spill] sm:$0xff] %v5191_v29  ;;  %6115 = vst [vmem:[#allocation153_spill] sm:$0xff] %v5214_v23  ;;  %v6116_v30 = vld [vmem:[#allocation23_spill] sm:$0xff]  ;;  %v6120_v29 = vld [vmem:[#allocation25_spill] sm:$0xff] }
 0x273   : > { %v2877_v51 = vsel %vm2873_vm0, %v6117_v46, %v6116_v30  ;;  %v2881_v30 = vsel %vm2873_vm0, %v6126_v25, %v4252_v44  ;;  %v6127_v46 = vld [vmem:[#allocation27_spill] sm:$0xff]  ;;  %v6130_v45 = vld [vmem:[#allocation16_spill] sm:$0xff]  ;;  %v6133_v23 = vld [vmem:[#allocation30_spill] sm:$0xff] }
 0x274   : > { %v5164_v21 = vpop.permute.xlu1 %2511  ;;  %v5166_v49 = vpop.permute.xlu0 %2513  ;;  %6110 = vst [vmem:[#allocation148_spill] sm:$0xff] %v5187_v55  ;;  %v6128_v55 = vld [vmem:[#allocation15_spill] sm:$0xff] }
 0x275   : > { %6106 = vst [vmem:[#allocation144_spill] sm:$0xff] %v5164_v21  ;;  %6107 = vst [vmem:[#allocation145_spill] sm:$0xff] %v5166_v49  ;;  %v2882_v2 = vsel %vm2873_vm0, %v6128_v55, %v6127_v46  ;;  %v6137_v55 = vld [vmem:[#allocation32_spill] sm:$0xff]  ;;  %v6139_v46 = vld [vmem:[#allocation33_spill] sm:$0xff] }
 0x276   : > { %2723 = vrot.lane.b32.xlu1 %v1715_v63, %s3626_s23  ;;  %2725 = vrot.lane.b32.xlu0 %v1813_v38, %s3626_s23  ;;  %v2874_v63 = vsel %vm2873_vm0, %v3802_v41, %v4201_v6  ;;  %v5211_v38 = vrot.slane %v1796_v7, %v3782_v35  ;;  %v6121_v41 = vld [vmem:[#allocation12_spill] sm:$0xff]  ;;  %v6146_v49 = vld [vmem:[#allocation38_spill] sm:$0xff] }
 0x277   : > { %v2879_v6 = vsel %vm2873_vm0, %v6121_v41, %v6120_v29  ;;  %v2883_v29 = vsel %vm2873_vm0, %v6130_v45, %v6129_v40  ;;  %v6131_v41 = vld [vmem:[#allocation29_spill] sm:$0xff]  ;;  %v6138_v45 = vld [vmem:[#allocation20_spill] sm:$0xff] }
 0x278   : > { %6114 = vst [vmem:[#allocation152_spill] sm:$0xff] %v5211_v38  ;;  %v5228_v7 = vpop.permute.xlu1 %2515  ;;  %v5230_v35 = vpop.permute.xlu0 %2517  ;;  %v2884_v60 = vsel %vm2873_vm0, %v6132_v0, %v6131_v41  ;;  %v2887_v25 = vsel %vm2873_vm0, %v6138_v45, %v6137_v55  ;;  %v6140_v0 = vld [vmem:[#allocation21_spill] sm:$0xff]  ;;  %v6141_v41 = vld [vmem:[#allocation34_spill] sm:$0xff]  ;;  %v6143_v38 = vld [vmem:[#allocation35_spill] sm:$0xff]  ;;  %v2894_v55 = vsel %vm2890_vm1, %v2877_v51, %v6146_v49 }
 0x279   : > { %6122 = vst [vmem:[#allocation23_spill] sm:$0xff] %v5228_v7  ;;  %6123 = vst [vmem:[#allocation10_spill] sm:$0xff] %v5230_v35  ;;  %v6134_v35 = vld [vmem:[#allocation18_spill] sm:$0xff]  ;;  %v6136_v7 = vld [vmem:[#allocation19_spill] sm:$0xff]  ;;  %v2888_v40 = vsel %vm2873_vm0, %v6140_v0, %v6139_v46 }
 0x27a   : > { %v2885_v52 = vsel %vm2873_vm0, %v6134_v35, %v6133_v23  ;;  %v2886_v44 = vsel %vm2873_vm0, %v6136_v7, %v6135_v43  ;;  %2727 = vrot.lane.b32.xlu1 %v1911_v56, %s3626_s23  ;;  %2761 = vrot.lane.b32.xlu0 %v438_v28, %s3627_s24  ;;  %v6142_v23 = vld [vmem:[#allocation22_spill] sm:$0xff]  ;;  %v2891_v7 = vsel %vm2890_vm1, %v2874_v63, %v6143_v38  ;;  %v6144_v56 = vld [vmem:[#allocation36_spill] sm:$0xff]  ;;  %v6145_v28 = vld [vmem:[#allocation37_spill] sm:$0xff] }
 0x27b   : > { %v2889_v35 = vsel %vm2873_vm0, %v6142_v23, %v6141_v41  ;;  %v2892_v43 = vsel %vm2890_vm1, %v2875_v31, %v6144_v56  ;;  %v2893_v22 = vsel %vm2890_vm1, %v2876_v4, %v6145_v28  ;;  %v6147_v45 = vld [vmem:[#allocation39_spill] sm:$0xff]  ;;  %v6150_v41 = vld [vmem:[#allocation40_spill] sm:$0xff]  ;;  %v6151_v38 = vld [vmem:[#allocation41_spill] sm:$0xff] }
 0x27c   : > { %v2895_v46 = vsel %vm2890_vm1, %v2878_v12, %v6147_v45  ;;  %v5274_v0 = vpop.permute.xlu1 %2519  ;;  %v5276_v21 = vpop.permute.xlu0 %2521  ;;  %v2896_v63 = vsel %vm2890_vm1, %v2879_v6, %v6150_v41  ;;  %v2897_v23 = vsel %vm2890_vm1, %v2880_v48, %v6151_v38  ;;  %v6152_v31 = vld [vmem:[#allocation42_spill] sm:$0xff]  ;;  %v6153_v4 = vld [vmem:[#allocation43_spill] sm:$0xff]  ;;  %v6154_v51 = vld [vmem:[#allocation44_spill] sm:$0xff] }
 0x27d   : > { %6148 = vst [vmem:[#allocation24_spill] sm:$0xff] %v5274_v0  ;;  %6149 = vst [vmem:[#allocation11_spill] sm:$0xff] %v5276_v21  ;;  %v2898_v56 = vsel %vm2890_vm1, %v2881_v30, %v6152_v31  ;;  %v2899_v28 = vsel %vm2890_vm1, %v2882_v2, %v6153_v4  ;;  %v2900_v49 = vsel %vm2890_vm1, %v2883_v29, %v6154_v51  ;;  %v6155_v12 = vld [vmem:[#allocation45_spill] sm:$0xff]  ;;  %v6156_v0 = vld [vmem:[#allocation46_spill] sm:$0xff] }
 0x27e   : > { %v2901_v45 = vsel %vm2890_vm1, %v2884_v60, %v6155_v12  ;;  %v2902_v21 = vsel %vm2890_vm1, %v2885_v52, %v6156_v0  ;;  %2763 = vrot.lane.b32.xlu1 %v5133_v58, %s3627_s24  ;;  %2765 = vrot.lane.b32.xlu0 %v5136_v26, %s3627_s24  ;;  %v6157_v6 = vld [vmem:[#allocation47_spill] sm:$0xff]  ;;  %v6158_v30 = vld [vmem:[#allocation48_spill] sm:$0xff]  ;;  %v6159_v29 = vld [vmem:[#allocation49_spill] sm:$0xff] }
 0x27f   : > { %v2903_v48 = vsel %vm2890_vm1, %v2886_v44, %v6157_v6  ;;  %v2904_v2 = vsel %vm2890_vm1, %v2887_v25, %v6158_v30  ;;  %v2905_v41 = vsel %vm2890_vm1, %v2888_v40, %v6159_v29  ;;  %v6160_v60 = vld [vmem:[#allocation50_spill] sm:$0xff]  ;;  %v6161_v52 = vld [vmem:[#allocation51_spill] sm:$0xff]  ;;  %v6162_v31 = vld [vmem:[#allocation52_spill] sm:$0xff] }
 0x280   : > { %v2906_v38 = vsel %vm2890_vm1, %v2889_v35, %v6160_v60  ;;  %v2908_v0 = vsel %vm2907_vm2, %v2891_v7, %v6161_v52  ;;  %v2909_v58 = vsel %vm2907_vm2, %v2892_v43, %v6162_v31  ;;  %v6163_v4 = vld [vmem:[#allocation53_spill] sm:$0xff]  ;;  %v6164_v51 = vld [vmem:[#allocation54_spill] sm:$0xff]  ;;  %v5312_v12 = vpop.permute.xlu1 %2523  ;;  %v5314_v25 = vpop.permute.xlu0 %2525  ;;  %v6165_v40 = vld [vmem:[#allocation55_spill] sm:$0xff] }
 0x281   : > { %v2910_v26 = vsel %vm2907_vm2, %v2893_v22, %v6163_v4  ;;  %v2911_v44 = vsel %vm2907_vm2, %v2894_v55, %v6164_v51  ;;  %v2912_v6 = vsel %vm2907_vm2, %v2895_v46, %v6165_v40  ;;  %v6166_v35 = vld [vmem:[#allocation56_spill] sm:$0xff]  ;;  %v6167_v7 = vld [vmem:[#allocation57_spill] sm:$0xff]  ;;  %v6168_v43 = vld [vmem:[#allocation58_spill] sm:$0xff] }
 0x282   : > { %v2913_v30 = vsel %vm2907_vm2, %v2896_v63, %v6166_v35  ;;  %v2914_v29 = vsel %vm2907_vm2, %v2897_v23, %v6167_v7  ;;  %v2915_v60 = vsel %vm2907_vm2, %v2898_v56, %v6168_v43  ;;  %v6169_v22 = vld [vmem:[#allocation59_spill] sm:$0xff]  ;;  %v6170_v55 = vld [vmem:[#allocation60_spill] sm:$0xff]  ;;  %v6171_v4 = vld [vmem:[#allocation65_spill] sm:$0xff]  ;;  %2767 = vrot.lane.b32.xlu1 %v5139_v15, %s3627_s24  ;;  %2769 = vrot.lane.b32.xlu0 %v5144_v14, %s3627_s24 }
 0x283   : > { %v2916_v52 = vsel %vm2907_vm2, %v2899_v28, %v6169_v22  ;;  %v5328_v31 = vsel %vm2907_vm2, %v2900_v49, %v6170_v55  ;;  %v2922_v51 = vsel %vm2907_vm2, %v2905_v41, %v6171_v4  ;;  %v6172_v46 = vld [vmem:[#allocation61_spill] sm:$0xff]  ;;  %v6173_v23 = vld [vmem:[#allocation62_spill] sm:$0xff]  ;;  %v6174_v28 = vld [vmem:[#allocation63_spill] sm:$0xff] }
 0x284   : > { %v5338_v63 = vsel %vm2907_vm2, %v2901_v45, %v6172_v46  ;;  %v5342_v56 = vsel %vm2907_vm2, %v2902_v21, %v6173_v23  ;;  %v5346_v49 = vsel %vm2907_vm2, %v2903_v48, %v6174_v28  ;;  %v6175_v41 = vld [vmem:[#allocation81_spill] sm:$0xff]  ;;  %v6176_v35 = vld [vmem:[#allocation64_spill] sm:$0xff]  ;;  %v6177_v14 = vld [vmem:[#allocation66_spill] sm:$0xff]  ;;  %v5360_v22 = vpop.permute.xlu1 %2527  ;;  %v5362_v48 = vpop.permute.xlu0 %2529 }
 0x285   : > { %v2939_v40 = vsel %vm2924_vm3, %v2922_v51, %v6175_v41  ;;  %v5352_v15 = vsel %vm2907_vm2, %v2904_v2, %v6176_v35  ;;  %v2923_v7 = vsel %vm2907_vm2, %v2906_v38, %v6177_v14  ;;  %v6178_v45 = vld [vmem:[#allocation67_spill] sm:$0xff]  ;;  %v6179_v55 = vld [vmem:[#allocation68_spill] sm:$0xff]  ;;  %v6180_v51 = vld [vmem:[#allocation69_spill] sm:$0xff] }
 0x286   : > { %v2925_v43 = vsel %vm2924_vm3, %v2908_v0, %v6178_v45  ;;  %v2956_v21 = vsel %vm2941_vm4, %v2939_v40, %v4658_v10  ;;  %v2926_v4 = vsel %vm2924_vm3, %v2909_v58, %v6179_v55  ;;  %v2927_v2 = vsel %vm2924_vm3, %v2910_v26, %v6180_v51  ;;  %v6181_v46 = vld [vmem:[#allocation70_spill] sm:$0xff]  ;;  %v6182_v0 = vld [vmem:[#allocation71_spill] sm:$0xff]  ;;  %v6183_v10 = vld [vmem:[#allocation72_spill] sm:$0xff]  ;;  %2771 = vrot.lane.b32.xlu1 %v5147_v5, %s3627_s24 }
 0x287   : > { %v2928_v23 = vsel %vm2924_vm3, %v2911_v44, %v6181_v46  ;;  %v2973_v38 = vsel %vm2958_vm5, %v2956_v21, %v4744_v3  ;;  %v2929_v28 = vsel %vm2924_vm3, %v2912_v6, %v6182_v0  ;;  %v5376_v41 = vsel %vm2924_vm3, %v2913_v30, %v6183_v10  ;;  %2773 = vrot.lane.b32.xlu0 %v5150_v61, %s3627_s24  ;;  %v6184_v58 = vld [vmem:[#allocation82_spill] sm:$0xff]  ;;  %v6185_v26 = vld [vmem:[#allocation83_spill] sm:$0xff]  ;;  %v6186_v45 = vld [vmem:[#allocation73_spill] sm:$0xff] }
 0x288   : > { %v2990_v40 = vsel %vm2975_vm6, %v2973_v38, %v4818_v33  ;;  %v2940_v3 = vsel %vm2924_vm3, %v2923_v7, %v6184_v58  ;;  %v2942_v44 = vsel %vm2941_vm4, %v2925_v43, %v6185_v26  ;;  %v5396_v14 = vpop.permute.xlu1 %2531  ;;  %v2534_v7 = vpop.permute.xlu0 %2533  ;;  %v2931_v43 = vsel %vm2924_vm3, %v2914_v29, %v6186_v45  ;;  %v6189_v29 = vld [vmem:[#allocation85_spill] sm:$0xff]  ;;  %v6191_v58 = vld [vmem:[#allocation119_spill] sm:$0xff] }
 0x289   : > { %v3007_v6 = vsel %vm2992_vm7, %v2990_v40, %v4963_v42  ;;  %v2957_v33 = vsel %vm2941_vm4, %v2940_v3, %v4664_v1  ;;  %v2959_v30 = vsel %vm2958_vm5, %v2942_v44, %v4666_v19  ;;  %v6187_v19 = vld [vmem:[#allocation74_spill] sm:$0xff]  ;;  %v6193_v26 = vld [vmem:[#allocation87_spill] sm:$0xff] }
 0x28a   : > { %v3024_v35 = vsel %vm3009_vm8, %v3007_v6, %v5077_v13  ;;  %v2974_v42 = vsel %vm2958_vm5, %v2957_v33, %v4754_v20  ;;  %v2976_v21 = vsel %vm2975_vm6, %v2959_v30, %v4756_v24  ;;  %v5409_v55 = vsel %vm2924_vm3, %v2915_v60, %v6187_v19  ;;  %2775 = vrot.lane.b32.xlu1 %v5153_v32, %s3627_s24  ;;  %v6188_v20 = vld [vmem:[#allocation84_spill] sm:$0xff]  ;;  %v6194_v6 = vld [vmem:[#allocation131_spill] sm:$0xff]  ;;  %v6196_v30 = vld [vmem:[#allocation97_spill] sm:$0xff] }
 0x28b   : > { %v5405_v1 = vsel %vm3026_vm9, %v3024_v35, %v2534_v7  ;;  %v2991_v13 = vsel %vm2975_vm6, %v2974_v42, %v4824_v59  ;;  %v2993_v51 = vsel %vm2992_vm7, %v2976_v21, %v4826_v47  ;;  %2777 = vrot.lane.b32.xlu0 %v5156_v8, %s3627_s24  ;;  %v2943_v24 = vsel %vm2941_vm4, %v2926_v4, %v6188_v20  ;;  %v6195_v33 = vld [vmem:[#allocation132_spill] sm:$0xff]  ;;  %v6197_v7 = vld [vmem:[#allocation98_spill] sm:$0xff] }
 0x28c   : > { %v2944_v60 = vsel %vm2941_vm4, %v2927_v2, %v6189_v29  ;;  %v3008_v46 = vsel %vm2992_vm7, %v2991_v13, %v4981_v50  ;;  %v3010_v59 = vsel %vm3009_vm8, %v2993_v51, %v4983_v36  ;;  %v2960_v47 = vsel %vm2958_vm5, %v2943_v24, %v4672_v11  ;;  %v2536_v10 = vpop.permute.xlu1 %2535  ;;  %v2570_v2 = vpop.permute.xlu0 %2569  ;;  %v6198_v19 = vld [vmem:[#allocation108_spill] sm:$0xff]  ;;  %v6199_v51 = vld [vmem:[#allocation109_spill] sm:$0xff] }
 0x28d   : > { %v2961_v38 = vsel %vm2958_vm5, %v2944_v60, %v4674_v17  ;;  %v3025_v0 = vsel %vm3009_vm8, %v3008_v46, %v5089_v34  ;;  %v3027_v4 = vsel %vm3026_vm9, %v3010_v59, %v5091_v37  ;;  %v2977_v50 = vsel %vm2975_vm6, %v2960_v47, %v4766_v39  ;;  %v6190_v17 = vld [vmem:[#allocation75_spill] sm:$0xff]  ;;  %v6192_v39 = vld [vmem:[#allocation86_spill] sm:$0xff]  ;;  %v6200_v60 = vld [vmem:[#allocation76_spill] sm:$0xff] }
 0x28e   : > { %v2978_v36 = vsel %vm2975_vm6, %v2961_v38, %v4768_v53  ;;  %v5440_v40 = vsel %vm3026_vm9, %v3025_v0, %v2536_v10  ;;  %v5443_v11 = vsel %vm3043_vm10, %v3027_v4, %v2570_v2  ;;  %v2933_v34 = vsel %vm2924_vm3, %v2916_v52, %v6190_v17  ;;  %2779 = vrot.lane.b32.xlu1 %v5159_v9, %s3627_s24  ;;  %v6201_v46 = vld [vmem:[#allocation120_spill] sm:$0xff]  ;;  %v6202_v59 = vld [vmem:[#allocation121_spill] sm:$0xff]  ;;  %v6207_v17 = vld [vmem:[#allocation99_spill] sm:$0xff] }
 0x28f   : > { %v2994_v37 = vsel %vm2992_vm7, %v2977_v50, %v4834_v18  ;;  %v2995_v3 = vsel %vm2992_vm7, %v2978_v36, %v6191_v58  ;;  %2781 = vrot.lane.b32.xlu0 %v5162_v16, %s3627_s24  ;;  %v2945_v53 = vsel %vm2941_vm4, %v2928_v23, %v6192_v39  ;;  %v2946_v44 = vsel %vm2941_vm4, %v2929_v28, %v6193_v26  ;;  %v6203_v38 = vld [vmem:[#allocation88_spill] sm:$0xff]  ;;  %v6204_v4 = vld [vmem:[#allocation89_spill] sm:$0xff]  ;;  %v6206_v50 = vld [vmem:[#allocation134_spill] sm:$0xff] }
 0x290   : > { %v3011_v52 = vsel %vm3009_vm8, %v2994_v37, %v6194_v6  ;;  %v3012_v18 = vsel %vm3009_vm8, %v2995_v3, %v6195_v33  ;;  %v2962_v35 = vsel %vm2958_vm5, %v2945_v53, %v6196_v30  ;;  %v2963_v45 = vsel %vm2958_vm5, %v2946_v44, %v6197_v7  ;;  %v2572_v21 = vpop.permute.xlu1 %2571  ;;  %v2574_v28 = vpop.permute.xlu0 %2573  ;;  %v6208_v58 = vld [vmem:[#allocation100_spill] sm:$0xff]  ;;  %v6210_v26 = vld [vmem:[#allocation145_spill] sm:$0xff]  ;;  %v6211_v6 = vld [vmem:[#allocation110_spill] sm:$0xff] }
 0x291   : > { %v3028_v42 = vsel %vm3026_vm9, %v3011_v52, %v5121_v62  ;;  %v3029_v23 = vsel %vm3026_vm9, %v3012_v18, %v5123_v27  ;;  %v2979_v13 = vsel %vm2975_vm6, %v2962_v35, %v6198_v19  ;;  %v2980_v20 = vsel %vm2975_vm6, %v2963_v45, %v6199_v51  ;;  %v6209_v39 = vld [vmem:[#allocation144_spill] sm:$0xff]  ;;  %v6212_v33 = vld [vmem:[#allocation111_spill] sm:$0xff]  ;;  %v6213_v7 = vld [vmem:[#allocation77_spill] sm:$0xff] }
 0x292   : > { %v5476_v24 = vsel %vm3043_vm10, %v3028_v42, %v2572_v21  ;;  %v5479_v29 = vsel %vm3043_vm10, %v3029_v23, %v2574_v28  ;;  %v2934_v62 = vsel %vm2924_vm3, %v5328_v31, %v6200_v60  ;;  %v2996_v27 = vsel %vm2992_vm7, %v2979_v13, %v6201_v46  ;;  %2783 = vrot.lane.b32.xlu1 %v5173_v57, %s3627_s24  ;;  %v6205_v31 = vld [vmem:[#allocation133_spill] sm:$0xff]  ;;  %v6214_v42 = vld [vmem:[#allocation122_spill] sm:$0xff]  ;;  %v6215_v21 = vld [vmem:[#allocation123_spill] sm:$0xff] }
 0x293   : > { %v2997_v47 = vsel %vm2992_vm7, %v2980_v20, %v6202_v59  ;;  %2785 = vrot.lane.b32.xlu0 %v5179_v54, %s3627_s24  ;;  %v2947_v0 = vsel %vm2941_vm4, %v5376_v41, %v6203_v38  ;;  %v2948_v10 = vsel %vm2941_vm4, %v2931_v43, %v6204_v4  ;;  %v3013_v2 = vsel %vm3009_vm8, %v2996_v27, %v6205_v31  ;;  %v6216_v19 = vld [vmem:[#allocation150_spill] sm:$0xff]  ;;  %v6217_v13 = vld [vmem:[#allocation152_spill] sm:$0xff]  ;;  %v6219_v60 = vld [vmem:[#allocation91_spill] sm:$0xff] }
 0x294   : > { %v3014_v36 = vsel %vm3009_vm8, %v2997_v47, %v6206_v50  ;;  %v2964_v37 = vsel %vm2958_vm5, %v2947_v0, %v6207_v17  ;;  %v2965_v3 = vsel %vm2958_vm5, %v2948_v10, %v6208_v58  ;;  %v3030_v53 = vsel %vm3026_vm9, %v3013_v2, %v6209_v39  ;;  %v2576_v44 = vpop.permute.xlu1 %2575  ;;  %v2578_v43 = vpop.permute.xlu0 %2577  ;;  %v6218_v51 = vld [vmem:[#allocation90_spill] sm:$0xff]  ;;  %v6221_v59 = vld [vmem:[#allocation136_spill] sm:$0xff]  ;;  %v6222_v38 = vld [vmem:[#allocation101_spill] sm:$0xff] }
 0x295   : > { %v3031_v41 = vsel %vm3026_vm9, %v3014_v36, %v6210_v26  ;;  %v2981_v52 = vsel %vm2975_vm6, %v2964_v37, %v6211_v6  ;;  %v2982_v18 = vsel %vm2975_vm6, %v2965_v3, %v6212_v33  ;;  %v5514_v30 = vsel %vm3043_vm10, %v3030_v53, %v2576_v44  ;;  %v6223_v4 = vld [vmem:[#allocation102_spill] sm:$0xff]  ;;  %v6224_v31 = vld [vmem:[#allocation23_spill] sm:$0xff]  ;;  %v6226_v17 = vld [vmem:[#allocation112_spill] sm:$0xff] }
 0x296   : > { %v5517_v35 = vsel %vm3043_vm10, %v3031_v41, %v2578_v43  ;;  %v2935_v45 = vsel %vm2924_vm3, %v5338_v63, %v6213_v7  ;;  %v2998_v23 = vsel %vm2992_vm7, %v2981_v52, %v6214_v42  ;;  %v2999_v28 = vsel %vm2992_vm7, %v2982_v18, %v6215_v21  ;;  %2787 = vrot.lane.b32.xlu1 %v6216_v19, %s3627_s24  ;;  %v6220_v63 = vld [vmem:[#allocation135_spill] sm:$0xff]  ;;  %v6225_v50 = vld [vmem:[#allocation10_spill] sm:$0xff]  ;;  %v6227_v58 = vld [vmem:[#allocation113_spill] sm:$0xff] }
 0x297   : > { %2789 = vrot.lane.b32.xlu0 %v6217_v13, %s3627_s24  ;;  %v2949_v20 = vsel %vm2941_vm4, %v5409_v55, %v6218_v51  ;;  %v2950_v46 = vsel %vm2941_vm4, %v2933_v34, %v6219_v60  ;;  %v3015_v27 = vsel %vm3009_vm8, %v2998_v23, %v6220_v63  ;;  %v3016_v47 = vsel %vm3009_vm8, %v2999_v28, %v6221_v59  ;;  %v6228_v26 = vld [vmem:[#allocation78_spill] sm:$0xff]  ;;  %v6229_v44 = vld [vmem:[#allocation124_spill] sm:$0xff]  ;;  %v6230_v6 = vld [vmem:[#allocation125_spill] sm:$0xff] }
 0x298   : > { %v2966_v0 = vsel %vm2958_vm5, %v2949_v20, %v6222_v38  ;;  %v2967_v10 = vsel %vm2958_vm5, %v2950_v46, %v6223_v4  ;;  %v3032_v2 = vsel %vm3026_vm9, %v3015_v27, %v6224_v31  ;;  %v3033_v55 = vsel %vm3026_vm9, %v3016_v47, %v6225_v50  ;;  %v2580_v36 = vpop.permute.xlu1 %2579  ;;  %v2582_v34 = vpop.permute.xlu0 %2581  ;;  %v6231_v33 = vld [vmem:[#allocation153_spill] sm:$0xff]  ;;  %v6232_v18 = vld [vmem:[#allocation146_spill] sm:$0xff]  ;;  %v6233_v7 = vld [vmem:[#allocation92_spill] sm:$0xff] }
 0x299   : > { %v2983_v37 = vsel %vm2975_vm6, %v2966_v0, %v6226_v17  ;;  %v2984_v3 = vsel %vm2975_vm6, %v2967_v10, %v6227_v58  ;;  %v5552_v39 = vsel %vm3043_vm10, %v3032_v2, %v2580_v36  ;;  %v5555_v53 = vsel %vm3043_vm10, %v3033_v55, %v2582_v34  ;;  %v6234_v23 = vld [vmem:[#allocation93_spill] sm:$0xff]  ;;  %v6236_v51 = vld [vmem:[#allocation138_spill] sm:$0xff]  ;;  %v6237_v60 = vld [vmem:[#allocation103_spill] sm:$0xff] }
 0x29a   : > { %v2936_v41 = vsel %vm2924_vm3, %v5342_v56, %v6228_v26  ;;  %v3000_v43 = vsel %vm2992_vm7, %v2983_v37, %v6229_v44  ;;  %v3001_v52 = vsel %vm2992_vm7, %v2984_v3, %v6230_v6  ;;  %2791 = vrot.lane.b32.xlu1 %v6231_v33, %s3627_s24  ;;  %v2951_v42 = vsel %vm2941_vm4, %v2934_v62, %v6233_v7  ;;  %v6235_v56 = vld [vmem:[#allocation137_spill] sm:$0xff]  ;;  %v6238_v63 = vld [vmem:[#allocation104_spill] sm:$0xff]  ;;  %v6240_v38 = vld [vmem:[#allocation11_spill] sm:$0xff] }
 0x29b   : > { %2825 = vrot.lane.b32.xlu0 %v6232_v18, %s3628_s25  ;;  %v2952_v21 = vsel %vm2941_vm4, %v2935_v45, %v6234_v23  ;;  %v3017_v28 = vsel %vm3009_vm8, %v3000_v43, %v6235_v56  ;;  %v3018_v20 = vsel %vm3009_vm8, %v3001_v52, %v6236_v51  ;;  %v2968_v46 = vsel %vm2958_vm5, %v2951_v42, %v6237_v60  ;;  %v6239_v59 = vld [vmem:[#allocation24_spill] sm:$0xff]  ;;  %v6241_v4 = vld [vmem:[#allocation114_spill] sm:$0xff]  ;;  %v6242_v31 = vld [vmem:[#allocation115_spill] sm:$0xff] }
 0x29c   : > { %v2969_v27 = vsel %vm2958_vm5, %v2952_v21, %v6238_v63  ;;  %v3034_v47 = vsel %vm3026_vm9, %v3017_v28, %v6239_v59  ;;  %v3035_v62 = vsel %vm3026_vm9, %v3018_v20, %v6240_v38  ;;  %v2584_v0 = vpop.permute.xlu1 %2583  ;;  %v2586_v45 = vpop.permute.xlu0 %2585  ;;  %v2985_v10 = vsel %vm2975_vm6, %v2968_v46, %v6241_v4  ;;  %v6243_v36 = vld [vmem:[#allocation79_spill] sm:$0xff]  ;;  %v6244_v17 = vld [vmem:[#allocation126_spill] sm:$0xff]  ;;  %v6247_v44 = vld [vmem:[#allocation148_spill] sm:$0xff] }
 0x29d   : > { %v2986_v2 = vsel %vm2975_vm6, %v2969_v27, %v6242_v31  ;;  %v5589_v50 = vsel %vm3043_vm10, %v3034_v47, %v2584_v0  ;;  %v5592_v55 = vsel %vm3043_vm10, %v3035_v62, %v2586_v45  ;;  %v2937_v34 = vsel %vm2924_vm3, %v5346_v49, %v6243_v36  ;;  %v6245_v58 = vld [vmem:[#allocation127_spill] sm:$0xff]  ;;  %v6248_v43 = vld [vmem:[#allocation94_spill] sm:$0xff]  ;;  %v6251_v42 = vld [vmem:[#allocation140_spill] sm:$0xff] }
 0x29e   : > { %v3002_v37 = vsel %vm2992_vm7, %v2985_v10, %v6244_v17  ;;  %v3003_v3 = vsel %vm2992_vm7, %v2986_v2, %v6245_v58  ;;  %v6246_v26 = vld [vmem:[#allocation147_spill] sm:$0xff]  ;;  %v2953_v6 = vsel %vm2941_vm4, %v2936_v41, %v6248_v43  ;;  %v6252_v21 = vld [vmem:[#allocation105_spill] sm:$0xff]  ;;  %v6253_v28 = vld [vmem:[#allocation106_spill] sm:$0xff] }
 0x29f   : > { %2827 = vrot.lane.b32.xlu1 %v6246_v26, %s3628_s25  ;;  %2829 = vrot.lane.b32.xlu0 %v6247_v44, %s3628_s25  ;;  %v6249_v52 = vld [vmem:[#allocation95_spill] sm:$0xff]  ;;  %v3020_v23 = vsel %vm3009_vm8, %v3003_v3, %v6251_v42  ;;  %v2970_v56 = vsel %vm2958_vm5, %v2953_v6, %v6252_v21  ;;  %v6254_v63 = vld [vmem:[#allocation116_spill] sm:$0xff]  ;;  %v6255_v59 = vld [vmem:[#allocation117_spill] sm:$0xff]  ;;  %v6264_v3 = vmov 0.0  }
 0x2a0   : > { %v2954_v18 = vsel %vm2941_vm4, %v2937_v34, %v6249_v52  ;;  %v6250_v7 = vld [vmem:[#allocation139_spill] sm:$0xff]  ;;  %v3037_v41 = vsel %vm3026_vm9, %v3020_v23, %v5314_v25  ;;  %v2588_v60 = vpop.permute.xlu1 %2587  ;;  %v2590_v46 = vpop.permute.xlu0 %2589  ;;  %v2987_v27 = vsel %vm2975_vm6, %v2970_v56, %v6254_v63  ;;  %v6256_v0 = vld [vmem:[#allocation80_spill] sm:$0xff]  ;;  %v6258_v4 = vld [vmem:[#allocation129_spill] sm:$0xff]  ;;  %v932_v26 = vcombine.high %v5147_v5, %v6264_v3 }
 0x2a1   : > { %v3019_v49 = vsel %vm3009_vm8, %v3002_v37, %v6250_v7  ;;  %v2971_v51 = vsel %vm2958_vm5, %v2954_v18, %v6253_v28  ;;  %v5629_v62 = vsel %vm3043_vm10, %v3037_v41, %v2590_v46  ;;  %v6257_v45 = vld [vmem:[#allocation128_spill] sm:$0xff]  ;;  %v6259_v31 = vld [vmem:[#allocation149_spill] sm:$0xff]  ;;  %v6260_v2 = vld [vmem:[#allocation151_spill] sm:$0xff]  ;;  %v1128_v41 = vcombine.high %v5153_v32, %v6264_v3 }
 0x2a2   : > { %v3036_v20 = vsel %vm3026_vm9, %v3019_v49, %v5312_v12  ;;  %v2988_v47 = vsel %vm2975_vm6, %v2971_v51, %v6255_v59  ;;  %v2938_v12 = vsel %vm2924_vm3, %v5352_v15, %v6256_v0  ;;  %v3004_v25 = vsel %vm2992_vm7, %v2987_v27, %v6257_v45  ;;  %v6261_v36 = vld [vmem:[#allocation96_spill] sm:$0xff]  ;;  %v6262_v17 = vld [vmem:[#allocation141_spill] sm:$0xff]  ;;  %v6263_v58 = vld [vmem:[#allocation142_spill] sm:$0xff] }
 0x2a3   : > { %v5626_v38 = vsel %vm3043_vm10, %v3036_v20, %v2588_v60  ;;  %v3005_v10 = vsel %vm2992_vm7, %v2988_v47, %v6258_v4  ;;  %2831 = vrot.lane.b32.xlu1 %v6259_v31, %s3628_s25  ;;  %2833 = vrot.lane.b32.xlu0 %v6260_v2, %s3628_s25  ;;  %v2955_v34 = vsel %vm2941_vm4, %v2938_v12, %v6261_v36  ;;  %v6265_v44 = vld [vmem:[#allocation107_spill] sm:$0xff]  ;;  %v6266_v42 = vld [vmem:[#allocation118_spill] sm:$0xff] }
 0x2a4   : > { %v3021_v37 = vsel %vm3009_vm8, %v3004_v25, %v6262_v17  ;;  %v3022_v15 = vsel %vm3009_vm8, %v3005_v10, %v6263_v58  ;;  %v2972_v43 = vsel %vm2958_vm5, %v2955_v34, %v6265_v44  ;;  %v2592_v18 = vpop.permute.xlu1 %2591  ;;  %v2594_v7 = vpop.permute.xlu0 %2593  ;;  %v1030_v49 = vcombine.high %v5150_v61, %v6264_v3  ;;  %v6267_v56 = vld [vmem:[#allocation130_spill] sm:$0xff] }
 0x2a5   : > { %v3038_v6 = vsel %vm3026_vm9, %v3021_v37, %v5360_v22  ;;  %v3039_v52 = vsel %vm3026_vm9, %v3022_v15, %v5362_v48  ;;  %v2989_v23 = vsel %vm2975_vm6, %v2972_v43, %v6266_v42  ;;  %v6268_v22 = vld [vmem:[#allocation143_spill] sm:$0xff]  ;;  %v1226_v60 = vcombine.high %v5156_v8, %v6264_v3 }
 0x2a6   : > { %v3055_v21 = vsel %vm3043_vm10, %v3038_v6, %v2592_v18  ;;  %v3056_v5 = vsel %vm3043_vm10, %v3039_v52, %v2594_v7  ;;  %v3006_v28 = vsel %vm2992_vm7, %v2989_v23, %v6267_v56  ;;  %v1324_v59 = vcombine.high %v5159_v9, %v6264_v3 }
 0x2a7   : > { %2835 = vrot.lane.b32.xlu1 %v932_v26, %s3628_s25  ;;  %2837 = vrot.lane.b32.xlu0 %v1030_v49, %s3628_s25  ;;  %v3023_v48 = vsel %vm3009_vm8, %v3006_v28, %v6268_v22  ;;  %v1422_v32 = vcombine.high %v5162_v16, %v6264_v3  ;;  %v1520_v12 = vcombine.high %v5173_v57, %v6264_v3 }
 0x2a8   : > { %v3040_v61 = vsel %vm3026_vm9, %v3023_v48, %v5396_v14  ;;  %v2596_v51 = vpop.permute.xlu1 %2595  ;;  %v2598_v20 = vpop.permute.xlu0 %2597  ;;  %v1618_v9 = vcombine.high %v5179_v54, %v6264_v3  ;;  %v1716_v25 = vcombine.high %v6216_v19, %v6264_v3  ;;  %v1814_v57 = vcombine.high %v6217_v13, %v6264_v3 }
 0x2a9   : > { %v3057_v46 = vsel %vm3043_vm10, %v3040_v61, %v2596_v51  ;;  %v3058_v63 = vsel %vm3043_vm10, %v5405_v1, %v2598_v20  ;;  %v1912_v10 = vcombine.high %v6231_v33, %v6264_v3 }
 0x2ab   : > { %2839 = vrot.lane.b32.xlu1 %v1128_v41, %s3628_s25  ;;  %2841 = vrot.lane.b32.xlu0 %v1226_v60, %s3628_s25 }
 0x2ac   : > { %v2600_v27 = vpop.permute.xlu1 %2599  ;;  %v2634_v14 = vpop.permute.xlu0 %2633 }
 0x2ad   : > { %v3059_v8 = vsel %vm3043_vm10, %v5440_v40, %v2600_v27  ;;  %v3061_v47 = vsel %vm3060_vm11, %v5443_v11, %v2634_v14 }
 0x2af   : > { %2843 = vrot.lane.b32.xlu1 %v1324_v59, %s3628_s25  ;;  %2845 = vrot.lane.b32.xlu0 %v1422_v32, %s3628_s25 }
 0x2b0   : > { %v2636_v1 = vpop.permute.xlu1 %2635  ;;  %v2638_v0 = vpop.permute.xlu0 %2637 }
 0x2b1   : > { %v3062_v16 = vsel %vm3060_vm11, %v5476_v24, %v2636_v1  ;;  %v5697_v40 = vsel %vm3060_vm11, %v5479_v29, %v2638_v0 }
 0x2b3   : > { %2847 = vrot.lane.b32.xlu1 %v1520_v12, %s3628_s25  ;;  %2849 = vrot.lane.b32.xlu0 %v1618_v9, %s3628_s25 }
 0x2b4   : > { %v2640_v11 = vpop.permute.xlu1 %2639  ;;  %v2642_v45 = vpop.permute.xlu0 %2641 }
 0x2b5   : > { %v5707_v54 = vsel %vm3060_vm11, %v5514_v30, %v2640_v11  ;;  %v3065_v24 = vsel %vm3060_vm11, %v5517_v35, %v2642_v45 }
 0x2b7   : > { %2851 = vrot.lane.b32.xlu1 %v1716_v25, %s3628_s25  ;;  %2853 = vrot.lane.b32.xlu0 %v1814_v57, %s3628_s25 }
 0x2b8   : > { %v2644_v29 = vpop.permute.xlu1 %2643  ;;  %v2646_v4 = vpop.permute.xlu0 %2645 }
 0x2b9   : > { %v3066_v19 = vsel %vm3060_vm11, %v5552_v39, %v2644_v29  ;;  %v5719_v13 = vsel %vm3060_vm11, %v5555_v53, %v2646_v4 }
 0x2bb   : > { %2855 = vrot.lane.b32.xlu1 %v1912_v10, %s3628_s25 }
 0x2bc   : > { %v2648_v30 = vpop.permute.xlu1 %2647  ;;  %v2650_v35 = vpop.permute.xlu0 %2649 }
 0x2bd   : > { %v5724_v31 = vsel %vm3060_vm11, %v5589_v50, %v2648_v30  ;;  %v3069_v2 = vsel %vm3060_vm11, %v5592_v55, %v2650_v35 }
 0x2c0   : > { %v2652_v36 = vpop.permute.xlu1 %2651  ;;  %v2654_v33 = vpop.permute.xlu0 %2653 }
 0x2c1   : > { %v3070_v39 = vsel %vm3060_vm11, %v5626_v38, %v2652_v36  ;;  %v5732_v53 = vsel %vm3060_vm11, %v5629_v62, %v2654_v33 }
 0x2c4   : > { %v2656_v34 = vpop.permute.xlu1 %2655  ;;  %v2658_v17 = vpop.permute.xlu0 %2657 }
 0x2c5   : > { %v5735_v37 = vsel %vm3060_vm11, %v3055_v21, %v2656_v34  ;;  %v3073_v50 = vsel %vm3060_vm11, %v3056_v5, %v2658_v17  ;;  %v6269_v34 = vld [vmem:[#allocation8_spill] sm:$0xff] }
 0x2c8   : > { %v2660_v58 = vpop.permute.xlu1 %2659  ;;  %v2662_v15 = vpop.permute.xlu0 %2661 }
 0x2c9   : > { %v3074_v55 = vsel %vm3060_vm11, %v3057_v46, %v2660_v58  ;;  %v5740_v3 = vsel %vm3060_vm11, %v3058_v63, %v2662_v15 }
 0x2cc   : > { %v2664_v38 = vpop.permute.xlu1 %2663  ;;  %v2698_v26 = vpop.permute.xlu0 %2697 }
 0x2cd   : > { %v5743_v62 = vsel %vm3060_vm11, %v3059_v8, %v2664_v38  ;;  %v3078_v44 = vsel %vm3077_vm12, %v3061_v47, %v2698_v26 }
 0x2d0   : > { %v2700_v43 = vpop.permute.xlu1 %2699  ;;  %v2702_v6 = vpop.permute.xlu0 %2701 }
 0x2d1   : > { %v3079_v52 = vsel %vm3077_vm12, %v3062_v16, %v2700_v43  ;;  %v3080_v36 = vsel %vm3077_vm12, %v5697_v40, %v2702_v6 }
 0x2d4   : > { %v2704_v18 = vpop.permute.xlu1 %2703  ;;  %v2706_v7 = vpop.permute.xlu0 %2705 }
 0x2d5   : > { %v3082_v49 = vsel %vm3077_vm12, %v3065_v24, %v2706_v7  ;;  %v3081_v58 = vsel %vm3077_vm12, %v5707_v54, %v2704_v18 }
 0x2d8   : > { %v2708_v42 = vpop.permute.xlu1 %2707  ;;  %v2710_v23 = vpop.permute.xlu0 %2709 }
 0x2d9   : > { %v3083_v21 = vsel %vm3077_vm12, %v3066_v19, %v2708_v42  ;;  %v3084_v54 = vsel %vm3077_vm12, %v5719_v13, %v2710_v23 }
 0x2dc   : > { %v5749_v5 = vpop.permute.xlu1 %2711  ;;  %v2714_v56 = vpop.permute.xlu0 %2713 }
 0x2dd   : > { %v5752_v28 = vsel %vm3077_vm12, %v3069_v2, %v2714_v56  ;;  %v3085_v13 = vsel %vm3077_vm12, %v5724_v31, %v5749_v5 }
 0x2e0   : > { %v2716_v22 = vpop.permute.xlu1 %2715  ;;  %v5754_v48 = vpop.permute.xlu0 %2717 }
 0x2e1   : > { %v5757_v61 = vsel %vm3077_vm12, %v3070_v39, %v2716_v22 }
 0x2e4   : > { %v5759_v51 = vpop.permute.xlu1 %2719  ;;  %v2722_v20 = vpop.permute.xlu0 %2721 }
 0x2e5   : > { %v5762_v41 = vsel %vm3077_vm12, %v3073_v50, %v2722_v20 }
 0x2e8   : > { %v2724_v60 = vpop.permute.xlu1 %2723  ;;  %v5764_v46 = vpop.permute.xlu0 %2725 }
 0x2e9   : > { %v5767_v63 = vsel %vm3077_vm12, %v3074_v55, %v2724_v60 }
 0x2ec   : > { %v5769_v27 = vpop.permute.xlu1 %2727  ;;  %v2762_v14 = vpop.permute.xlu0 %2761 }
 0x2ed   : > { %v3095_v10 = vsel %vm3094_vm13, %v3078_v44, %v2762_v14 }
 0x2f0   : > { %v2764_v59 = vpop.permute.xlu1 %2763  ;;  %v2766_v32 = vpop.permute.xlu0 %2765 }
 0x2f1   : > { %v3096_v30 = vsel %vm3094_vm13, %v3079_v52, %v2764_v59  ;;  %v3097_v39 = vsel %vm3094_vm13, %v3080_v36, %v2766_v32 }
 0x2f4   : > { %v2768_v8 = vpop.permute.xlu1 %2767  ;;  %v2770_v47 = vpop.permute.xlu0 %2769 }
 0x2f5   : > { %v3098_v55 = vsel %vm3094_vm13, %v3081_v58, %v2768_v8  ;;  %v3099_v43 = vsel %vm3094_vm13, %v3082_v49, %v2770_v47  ;;  %v6270_v49 = vld [vmem:[#allocation9_spill] sm:$0xff] }
 0x2f8   : > { %v2772_v1 = vpop.permute.xlu1 %2771 }
 0x2f9   : > { %v2774_v0 = vpop.permute.xlu0 %2773  ;;  %v3100_v18 = vsel %vm3094_vm13, %v3083_v21, %v2772_v1 }
 0x2fa   : > { %v3101_v20 = vsel %vm3094_vm13, %v3084_v54, %v2774_v0 }
 0x2fc   : > { %v2776_v12 = vpop.permute.xlu1 %2775 }
 0x2fd   : > { %v2778_v9 = vpop.permute.xlu0 %2777  ;;  %v3102_v21 = vsel %vm3094_vm13, %v3085_v13, %v2776_v12 }
 0x300   : > { %v2780_v16 = vpop.permute.xlu1 %2779 }
 0x301   : > { %v5771_v11 = vpop.permute.xlu0 %2781 }
 0x304   : > { %v5773_v45 = vpop.permute.xlu1 %2783 }
 0x305   : > { %v5775_v25 = vpop.permute.xlu0 %2785 }
 0x308   : > { %v5777_v57 = vpop.permute.xlu1 %2787 }
 0x309   : > { %v5779_v24 = vpop.permute.xlu0 %2789 }
 0x30c   : > { %v5781_v29 = vpop.permute.xlu1 %2791 }
 0x30d   : > { %v2826_v4 = vpop.permute.xlu0 %2825 }
 0x30e   : > { %v3112_v19 = vsel %vm3111_vm14, %v3095_v10, %v2826_v4 }
 0x30f   : > { %v3131_v17 = vrot.slane %v3112_v19, %v6269_v34  ;;  %v3103_v19 = vsel %vm3094_vm13, %v5752_v28, %v2778_v9 }
 0x311   : > { %v2828_v35 = vpop.permute.xlu1 %2827  ;;  %v2830_v2 = vpop.permute.xlu0 %2829 }
 0x312   : > { %v3113_v33 = vsel %vm3111_vm14, %v3096_v30, %v2828_v35  ;;  %v3114_v15 = vsel %vm3111_vm14, %v3097_v39, %v2830_v2  ;;  %v3088_v30 = vsel %vm3077_vm12, %v5732_v53, %v5754_v48  ;;  %v3104_v35 = vsel %vm3094_vm13, %v5757_v61, %v2780_v16 }
 0x313   : > { %v3135_v50 = vrot.slane %v3113_v33, %v6269_v34  ;;  %v3139_v6 = vrot.slane %v3114_v15, %v6269_v34  ;;  %v3105_v36 = vsel %vm3094_vm13, %v3088_v30, %v5771_v11  ;;  %v3089_v48 = vsel %vm3077_vm12, %v5735_v37, %v5759_v51 }
 0x314   : > { %v3106_v16 = vsel %vm3094_vm13, %v3089_v48, %v5773_v45  ;;  %v3092_v45 = vsel %vm3077_vm12, %v5740_v3, %v5764_v46 }
 0x315   : > { %v3208_v38 = vcombine.low %v3131_v17, %v3135_v50  ;;  %v2832_v26 = vpop.permute.xlu1 %2831  ;;  %v2834_v44 = vpop.permute.xlu0 %2833 }
 0x316   : > { %v3115_v40 = vsel %vm3111_vm14, %v3098_v55, %v2832_v26  ;;  %v3116_v7 = vsel %vm3111_vm14, %v3099_v43, %v2834_v44  ;;  %v3107_v26 = vsel %vm3094_vm13, %v5762_v41, %v5775_v25  ;;  %v3109_v25 = vsel %vm3094_vm13, %v3092_v45, %v5779_v24 }
 0x317   : > { %v3143_v52 = vrot.slane %v3115_v40, %v6269_v34  ;;  %v3216_v14 = vrot.slane %v3208_v38, %v6270_v49  ;;  %v3147_v32 = vrot.slane %v3116_v7, %v6269_v34  ;;  %v3108_v40 = vsel %vm3094_vm13, %v5767_v63, %v5777_v57 }
 0x318   : > { %v3093_v63 = vsel %vm3077_vm12, %v5743_v62, %v5769_v27 }
 0x319   : > { %v3209_v42 = vcombine.low %v3139_v6, %v3143_v52  ;;  %v2836_v56 = vpop.permute.xlu1 %2835  ;;  %v2838_v22 = vpop.permute.xlu0 %2837  ;;  %v3110_v24 = vsel %vm3094_vm13, %v3093_v63, %v5781_v29 }
 0x31a   : > { %v3117_v60 = vsel %vm3111_vm14, %v3100_v18, %v2836_v56  ;;  %v3118_v23 = vsel %vm3111_vm14, %v3101_v20, %v2838_v22 }
 0x31b   : > { %v3223_v59 = vrot.slane %v3209_v42, %v6270_v49  ;;  %v3151_v8 = vrot.slane %v3117_v60, %v6269_v34  ;;  %v3155_v31 = vrot.slane %v3118_v23, %v6269_v34 }
 0x31d   : > { %v3224_v47 = vcombine.low %v3216_v14, %v3223_v59  ;;  %v3225_v1 = vcombine.low %v3147_v32, %v3151_v8  ;;  %v2840_v0 = vpop.permute.xlu1 %2839  ;;  %v2842_v4 = vpop.permute.xlu0 %2841 }
 0x31e   : > { %v3119_v10 = vsel %vm3111_vm14, %v3102_v21, %v2840_v0  ;;  %v3120_v12 = vsel %vm3111_vm14, %v3103_v19, %v2842_v4 }
 0x31f   : > { %3281 = vst.msk [vmem:[%s5819_s3] sm:$0xff] %vm3280_vm15, %v3224_v47  ;;  %v3159_v5 = vrot.slane %v3119_v10, %v6269_v34  ;;  %v3233_v39 = vrot.slane %v3225_v1, %v6270_v49  ;;  %v3163_v50 = vrot.slane %v3120_v12, %v6269_v34 }
 0x321   : > { %v3226_v2 = vcombine.low %v3155_v31, %v3159_v5  ;;  %v2844_v28 = vpop.permute.xlu1 %2843  ;;  %v2846_v9 = vpop.permute.xlu0 %2845 }
 0x322   : > { %v3121_v33 = vsel %vm3111_vm14, %v3104_v35, %v2844_v28  ;;  %v3122_v61 = vsel %vm3111_vm14, %v3105_v36, %v2846_v9 }
 0x323   : > { %v3240_v17 = vrot.slane %v3226_v2, %v6270_v49  ;;  %v3167_v53 = vrot.slane %v3121_v33, %v6269_v34  ;;  %v3171_v44 = vrot.slane %v3122_v61, %v6269_v34 }
 0x325   : > { %v3241_v11 = vcombine.low %v3233_v39, %v3240_v17  ;;  %v3242_v58 = vcombine.low %v3163_v50, %v3167_v53  ;;  %v2848_v15 = vpop.permute.xlu1 %2847  ;;  %v2850_v55 = vpop.permute.xlu0 %2849 }
 0x326   : > { %v3123_v38 = vsel %vm3111_vm14, %v3106_v16, %v2848_v15  ;;  %v3124_v51 = vsel %vm3111_vm14, %v3107_v26, %v2850_v55 }
 0x327   : > { %3282 = vst.msk [vmem:[%s5819_s3 + $0x8] sm:$0xff] %vm3280_vm15, %v3241_v11  ;;  %v3175_v37 = vrot.slane %v3123_v38, %v6269_v34  ;;  %v3250_v7 = vrot.slane %v3242_v58, %v6270_v49  ;;  %v3179_v3 = vrot.slane %v3124_v51, %v6269_v34 }
 0x329   : > { %v3243_v43 = vcombine.low %v3171_v44, %v3175_v37  ;;  %v2852_v6 = vpop.permute.xlu1 %2851  ;;  %v2854_v41 = vpop.permute.xlu0 %2853 }
 0x32a   : > { %v3125_v52 = vsel %vm3111_vm14, %v3108_v40, %v2852_v6  ;;  %v3126_v57 = vsel %vm3111_vm14, %v3109_v25, %v2854_v41 }
 0x32b   : > { %v3257_v54 = vrot.slane %v3243_v43, %v6270_v49  ;;  %v3183_v46 = vrot.slane %v3125_v52, %v6269_v34  ;;  %v3187_v20 = vrot.slane %v3126_v57, %v6269_v34 }
 0x32d   : > { %v3258_v18 = vcombine.low %v3250_v7, %v3257_v54  ;;  %v3259_v42 = vcombine.low %v3179_v3, %v3183_v46  ;;  %v2856_v56 = vpop.permute.xlu1 %2855 }
 0x32e   : > { %v3127_v22 = vsel %vm3111_vm14, %v3110_v24, %v2856_v56 }
 0x32f   : > { %3283 = vst.msk [vmem:[%s5819_s3 + $0x10] sm:$0xff] %vm3280_vm15, %v3258_v18  ;;  %v3191_v60 = vrot.slane %v3127_v22, %v6269_v34  ;;  %v3267_v27 = vrot.slane %v3259_v42, %v6270_v49 }
 0x331   : > { %v3260_v62 = vcombine.low %v3187_v20, %v3191_v60 }
 0x333   : > { %v3274_v29 = vrot.slane %v3260_v62, %v6270_v49 }
 0x335   : > { %v3275_v14 = vcombine.low %v3267_v27, %v3274_v29 }
 0x337   : > { %3284 = vst.msk [vmem:[%s5819_s3 + $0x18] sm:$0xff] %vm3280_vm15, %v3275_v14 }
 0x338   : > { %3537 = shalt.err (!%p3534_p3)
}
 0x339   : > { %s3538_s16 = scalar_lea.hbm %s5884_s2, 512  ;;  %s3542_s23 = scalar_lea.hbm %s5938_s1, 4096 }
 0x33a   : > { %p3539_p4 = scmp.ne.s32.totalorder %s5884_s2, %s3538_s16  ;;  %p3543_p0 = scmp.lt.u32.totalorder %s5884_s2, %s5938_s1 }
 0x33b   : > { %p3544_p2 = scmp.lt.u32.totalorder %s3542_s23, %s3538_s16  ;;  %p3546_p8 = scmp.lt.u32.totalorder %s3538_s16, %s5884_s2 }
 0x33c   : > { %p3540_p6 = pnand %p3539_p4, %p6271_p9 }
 0x33d   : > { %p3545_p5 = por %p3544_p2, %p3543_p0 }
 0x33e   : > { %p3541_p7 = pneg %p3540_p6 }
 0x33f   : > { %p3547_p11 = por %p3546_p8, %p3545_p5 }
 0x341   : > { %p3548_p13 = pnand %p3547_p11, %p3541_p7 }
 0x343   : > { %3551 = shalt.err (!%p3548_p13)
}
 0x344   : > { %s3630_s28 = smov 128  }
 0x345   : > { %3413 = dma.vmem_to_hbm [thread:$0]  (%p6271_p9), %s5886_s18, 512, %s5884_s2, %s3286_s5, %s3630_s28, %s3630_s28, %s3617_s30  }
 0x346 PF: > { %p3424_p10 = scmp.ge.s32.totalorder %s3606_s11, 2  ;;  %s3317_s3 = sand.u32 1, %s3586_s6  }
 0x347   : > { %p6272_p12 = scmp.ne.s32.totalorder %s5966_s21, 0  ;;  %s3318_s4 = scalar_lea.sflag [#allocation4], %s3317_s3 }
 0x349   : > { %p3420_p1 = pnand %p3424_p10, %p6272_p12 }
 0x34b   : > { %3581 = dma.done.wait (!%p3420_p1), %s3318_s4, 512  }
 0x34c   : > { %3583 = vsyncadd (!%p3420_p1), %s3318_s4, 4294966784  ;;  %s17_s11 = sadd.s32 1, %s3606_s11   ;;  %s6273_s6 = smov %s3590_s7 }
 0x34d   : > { %p14_p3 = scmp.ge.s32.totalorder %s17_s11, 10   ;;  %s6274_s7 = smov %s3594_s8 }
 0x34e   : > { %s6275_s8 = smov %s3697_s20  ;;  %s6276_s9 = smov %s3602_s10 }
 0x34f   : > { %s6277_s10 = smov %s6279_s14  ;;  %16 = sbr.rel (!%p14_p3) target bundleno = 6 (0x6), region = 69 }
 0x356   :  { %3323 = vsyncpa [#allocation3], 1 }
 0x357   :  { %3325 = vsyncpa [#allocation3 + $0x1], 1 }
 0x358   :  { %3326 = vsyncpa [#allocation4], 1 }
 0x359   :  { %3328 = vsyncpa [#allocation4 + $0x1], 1 }

</bundles_post_ra>
